<compile_context>
chip_gen: v6e
topology: v6e:2x2x1
jax: 0.10.0
libtpu: 0.0.40
codegen_flags: <defaults>
</compile_context>

<pallas_src>
import math

import jax
import jax.numpy as jnp
from jax.experimental import pallas as pl
from jax.experimental.pallas import tpu as pltpu

# ----- synthetic model hyper-parameters (small, TPU-friendly) -----
B = 2          # batch
T = 8          # sequence length (queries ++ responses)
D = 32         # hidden size
H = 2          # attention heads
HD = D // H    # head dim
L = 2          # transformer layers
V = 64         # vocab size
F = 4 * D      # MLP hidden (== 128 lanes exactly)
N = B * T
PAD_TOKEN = V - 1
LN_EPS = 1e-5
NEG = -1e9

# ----- packed weight-slab layout: one (SLAB_ROWS, 128) f32 array -----
LANES = 128
ROWS_VEC = 8                    # per-layer LN/bias vectors (8 rows)
ROWS_QKVO = D                   # [wqkv (32,96) | wo (32,32)] packed in lanes
ROWS_W1 = D                     # w1 (32,128)
ROWS_W2 = F                     # w2 (128,32) in lanes [0,32)
ROWS_PER_LAYER = ROWS_VEC + ROWS_QKVO + ROWS_W1 + ROWS_W2      # 200
ROWS_FIN = 8                    # lnfg, lnfb, gain*whp, folded-bias/D
SLAB_ROWS = L * ROWS_PER_LAYER + ROWS_FIN                      # 408
# row indices inside the per-layer 8-row vector block
_LN1G, _LN1B, _BO, _LN2G, _LN2B, _B2, _B1, _BQKV = range(8)
# row offsets inside a layer
_OFF_QKVO = ROWS_VEC
_OFF_W1 = ROWS_VEC + ROWS_QKVO
_OFF_W2 = ROWS_VEC + ROWS_QKVO + ROWS_W1


def _ln(x2, g, b):
    """LayerNorm over the last (lane) axis."""
    mu = jnp.mean(x2, axis=-1, keepdims=True)
    xc = x2 - mu
    var = jnp.mean(xc * xc, axis=-1, keepdims=True)
    return xc * jax.lax.rsqrt(var + LN_EPS) * g + b


def _gelu(x):
    """tanh-approximation GELU (EUP friendly)."""
    c = math.sqrt(2.0 / math.pi)
    return 0.5 * x * (1.0 + jnp.tanh(c * (x + 0.044715 * x * x * x)))


def reward_kernel(x_ref, kbias_ref, wslab_ref, out_ref):
    scale = 1.0 / math.sqrt(HD)
    h2 = x_ref[...]                                              # (N, D), flattened in wrapper

    # Additive causal + padding bias, built once in-kernel (pure VPU work).
    qi = jax.lax.broadcasted_iota(jnp.int32, (T, T), 0)
    ki = jax.lax.broadcasted_iota(jnp.int32, (T, T), 1)
    causal = jnp.where(qi >= ki, 0.0, NEG)                       # (T, T)
    bias = kbias_ref[...][:, None, :] + causal[None, :, :]       # (B, T, T)

    for l in range(L):                  # static unrolled: L tiny, all weights resident
        base = l * ROWS_PER_LAYER
        vec = wslab_ref[base:base + ROWS_VEC, :]                 # (8, 128)
        qkvo = wslab_ref[base + _OFF_QKVO:base + _OFF_QKVO + D, :]       # (32, 128)
        w1 = wslab_ref[base + _OFF_W1:base + _OFF_W1 + D, :]             # (32, 128)
        w2 = wslab_ref[base + _OFF_W2:base + _OFF_W2 + F, :D]            # (128, 32)

        ln1g = vec[_LN1G:_LN1G + 1, :D]
        ln1b = vec[_LN1B:_LN1B + 1, :D]
        bo = vec[_BO:_BO + 1, :D]
        ln2g = vec[_LN2G:_LN2G + 1, :D]
        ln2b = vec[_LN2B:_LN2B + 1, :D]
        b2 = vec[_B2:_B2 + 1, :D]
        b1 = vec[_B1:_B1 + 1, :]
        bqkv = vec[_BQKV:_BQKV + 1, :3 * D]
        wqkv = qkvo[:, :3 * D]                                   # (32, 96) fused Q|K|V
        wo = qkvo[:, 3 * D:]                                     # (32, 32)

        # ---------------- attention block ----------------
        xn = _ln(h2, ln1g, ln1b)
        qkv = (jnp.dot(xn, wqkv, preferred_element_type=jnp.float32) + bqkv
               ).reshape(B, T, 3 * D)                            # one wide MXU dot per layer
        o_heads = []
        for hh in range(H):             # static; head split = static lane slices (XLU)
            q = qkv[:, :, hh * HD:(hh + 1) * HD]
            k = qkv[:, :, D + hh * HD:D + (hh + 1) * HD]
            v = qkv[:, :, 2 * D + hh * HD:2 * D + (hh + 1) * HD]
            s = jnp.einsum('bqe,bke->bqk', q, k,
                           preferred_element_type=jnp.float32) * scale + bias
            s = s - jnp.max(s, axis=-1, keepdims=True)
            p = jnp.exp(s)
            p = p / jnp.sum(p, axis=-1, keepdims=True)           # exact divide (VALU has slack)
            o_heads.append(jnp.einsum('bqk,bke->bqe', p, v,
                                      preferred_element_type=jnp.float32))
        o = jnp.concatenate(o_heads, axis=-1).reshape(N, D)      # (N, D)
        h2 = h2 + jnp.dot(o, wo, preferred_element_type=jnp.float32) + bo

        # ---------------- MLP block ----------------
        xn2 = _ln(h2, ln2g, ln2b)
        m = _gelu(jnp.dot(xn2, w1, preferred_element_type=jnp.float32) + b1)
        h2 = h2 + jnp.dot(m, w2, preferred_element_type=jnp.float32) + b2

    # ----- final LN + hp head on the LAST position only (== lm_output['hp'][:, -1]) -----
    fb = L * ROWS_PER_LAYER
    fin = wslab_ref[fb:fb + ROWS_FIN, :]                         # rows: lnfg, lnfb, gain*whp, bias/D
    h_last = h2.reshape(B, T, D)[:, T - 1, :]                    # (B, D)
    hn = _ln(h_last, fin[0:1, :D], fin[1:2, :D])
    # (B,D)@(D,1) matmul replaced by a VPU/XLU lane reduction; gain/bias folded in packing.
    reward = jnp.sum(hn * fin[2:3, :D] + fin[3:4, :D], axis=-1, keepdims=True)   # (B, 1)
    out_ref[...] = jnp.broadcast_to(reward, (B, LANES))          # lane-dense (unmasked) store


def init_params(key):
    keys = jax.random.split(key, 8)
    s = 0.02
    f32 = jnp.float32
    return dict(
        wte=jax.random.normal(keys[0], (V, D), f32) * s,
        wpe=jax.random.normal(keys[1], (T, D), f32) * 0.01,
        ln1g=jnp.ones((L, D), f32), ln1b=jnp.zeros((L, D), f32),
        wqkv=jax.random.normal(keys[2], (L, D, 3 * D), f32) * s,
        bqkv=jnp.zeros((L, 3 * D), f32),
        wo=jax.random.normal(keys[3], (L, D, D), f32) * s,
        bo=jnp.zeros((L, D), f32),
        ln2g=jnp.ones((L, D), f32), ln2b=jnp.zeros((L, D), f32),
        w1=jax.random.normal(keys[4], (L, D, F), f32) * s,
        b1=jnp.zeros((L, F), f32),
        w2=jax.random.normal(keys[5], (L, F, D), f32) * s,
        b2=jnp.zeros((L, D), f32),
        lnfg=jnp.ones((1, D), f32), lnfb=jnp.zeros((1, D), f32),
        whp=jax.random.normal(keys[6], (D, 1), f32) * s,
        bhp=jnp.zeros((1, 1), f32),
        reward_gain=jnp.ones((1, 1), f32),     # nn.Parameter(torch.ones(()))
        reward_bias=jnp.zeros((1, 1), f32),    # nn.Parameter(torch.zeros(()))
    )


def _pack_params(params):
    """One-time (init-path) packing into a single lane-dense (408, 128) f32 slab."""
    f32 = jnp.float32
    slab = jnp.zeros((SLAB_ROWS, LANES), f32)
    for l in range(L):
        base = l * ROWS_PER_LAYER
        slab = slab.at[base + _LN1G, :D].set(params['ln1g'][l])
        slab = slab.at[base + _LN1B, :D].set(params['ln1b'][l])
        slab = slab.at[base + _BO, :D].set(params['bo'][l])
        slab = slab.at[base + _LN2G, :D].set(params['ln2g'][l])
        slab = slab.at[base + _LN2B, :D].set(params['ln2b'][l])
        slab = slab.at[base + _B2, :D].set(params['b2'][l])
        slab = slab.at[base + _B1, :].set(params['b1'][l])
        slab = slab.at[base + _BQKV, :3 * D].set(params['bqkv'][l])
        slab = slab.at[base + _OFF_QKVO:base + _OFF_QKVO + D, :3 * D].set(params['wqkv'][l])
        slab = slab.at[base + _OFF_QKVO:base + _OFF_QKVO + D, 3 * D:].set(params['wo'][l])
        slab = slab.at[base + _OFF_W1:base + _OFF_W1 + D, :].set(params['w1'][l])
        slab = slab.at[base + _OFF_W2:base + _OFF_W2 + F, :D].set(params['w2'][l])
    fb = L * ROWS_PER_LAYER
    gain = params['reward_gain'][0, 0]
    hp_bias = gain * params['bhp'][0, 0] + params['reward_bias'][0, 0]
    slab = slab.at[fb + 0, :D].set(params['lnfg'][0])
    slab = slab.at[fb + 1, :D].set(params['lnfb'][0])
    slab = slab.at[fb + 2, :D].set(gain * params['whp'][:, 0])
    slab = slab.at[fb + 3, :D].set(jnp.full((D,), 1.0, f32) * (hp_bias / D))
    return slab


@jax.jit
def reward_model_forward(tokens, wte, wpe, wslab):
    # Per-call glue (embedding gathers + flatten + key padding bias) — all under jit.
    pos = jnp.arange(T)
    x2 = (wte[tokens] + wpe[pos][None, :, :]).astype(jnp.float32).reshape(N, D)
    kbias = jnp.where(tokens != PAD_TOKEN, 0.0, NEG).astype(jnp.float32)     # (B, T)

    vmem = pl.BlockSpec(memory_space=pltpu.MemorySpace.VMEM)
    out = pl.pallas_call(
        reward_kernel,
        out_shape=jax.ShapeDtypeStruct((B, LANES), jnp.float32),
        in_specs=[vmem, vmem, vmem],
        out_specs=vmem,
    )(x2, kbias, wslab)
    return out[:, 0]                                                         # (B,)


def reward_model_reference(tokens, params):
    """Pure-JAX reference of the same forward (uses the RAW, unpacked params)."""
    pos = jnp.arange(T)
    x = params['wte'][tokens] + params['wpe'][pos][None, :, :]
    rows = jnp.arange(T)[:, None]
    cols = jnp.arange(T)[None, :]
    causal = jnp.where(rows >= cols, 0.0, NEG)
    kbias = jnp.where(tokens != PAD_TOKEN, 0.0, NEG)
    attn_bias = kbias[:, None, :] + causal[None, :, :]                       # (B, T, T)

    h2 = x.reshape(N, D).astype(jnp.float32)
    scale = 1.0 / math.sqrt(HD)
    for l in range(L):
        xn = _ln(h2, params['ln1g'][l:l + 1], params['ln1b'][l:l + 1])
        qkv3 = (xn @ params['wqkv'][l] + params['bqkv'][l:l + 1]).reshape(B, T, 3 * D)
        acc = jnp.zeros((N, D), jnp.float32)
        for hh in range(H):
            q = qkv3[:, :, hh * HD:(hh + 1) * HD]
            k = qkv3[:, :, D + hh * HD:D + (hh + 1) * HD]
            v = qkv3[:, :, 2 * D + hh * HD:2 * D + (hh + 1) * HD]
            s = jnp.einsum('bqd,bkd->bqk', q, k) * scale + attn_bias
            s = s - jnp.max(s, -1, keepdims=True)
            p = jnp.exp(s)
            p = p / jnp.sum(p, -1, keepdims=True)
            o_h = jnp.einsum('bqk,bkd->bqd', p, v)
            acc = acc + o_h.reshape(N, HD) @ params['wo'][l][hh * HD:(hh + 1) * HD]
        h2 = h2 + acc + params['bo'][l:l + 1]
        xn2 = _ln(h2, params['ln2g'][l:l + 1], params['ln2b'][l:l + 1])
        m = _gelu(xn2 @ params['w1'][l] + params['b1'][l:l + 1])
        h2 = h2 + m @ params['w2'][l] + params['b2'][l:l + 1]
    hn = _ln(h2, params['lnfg'], params['lnfb'])
    h_last = hn.reshape(B, T, D)[:, T - 1, :]
    hp_last = h_last @ params['whp'] + params['bhp'][0, 0]
    return (params['reward_gain'][0, 0] * hp_last + params['reward_bias'][0, 0])[:, 0]


# TODO(synk): save()/configure_optimizers()/set_reward_norm()/reset_reward_scale()/
#             set_grad_sync() are training/checkpoint-IO methods with no kernel
#             equivalent; only forward() / get_rewards() are implemented.

if __name__ == "__main__":
    key = jax.random.PRNGKey(0)
    pkey, qkey, rkey = jax.random.split(key, 3)
    params = init_params(pkey)

    # Pack ONCE at init (hoisted out of the per-call path) and reuse the slab.
    wslab = jax.block_until_ready(_pack_params(params))

    # get_rewards(queries, responses): tokens = concat along seq dim
    queries = jax.random.randint(qkey, (B, T // 2), 0, V - 1, dtype=jnp.int32)
    responses = jax.random.randint(rkey, (B, T // 2), 0, V - 1, dtype=jnp.int32)
    tokens = jnp.concatenate([queries, responses], axis=1)                   # (B, T) int32

    out = reward_model_forward(tokens, params['wte'], params['wpe'], wslab)
    out = jax.block_until_ready(out)

    ref = reward_model_reference(tokens, params)
    assert out.shape == (B,), out.shape
    assert bool(jnp.all(jnp.isfinite(out)))
    assert bool(jnp.allclose(out, ref, atol=2e-3, rtol=2e-3)), (out, ref)
    print("KERNEL_OK")
</pallas_src>

<mosaic_0001>
module attributes {stable_mosaic.version = 11 : i64} {
  func.func @reward_kernel(%arg0: memref<16x32xf32, #tpu.memory_space<vmem>>, %arg1: memref<2x8xf32, #tpu.memory_space<vmem>>, %arg2: memref<408x128xf32, #tpu.memory_space<vmem>>, %arg3: memref<2x128xf32, #tpu.memory_space<vmem>>) attributes {dimension_semantics = [], scalar_prefetch = 0 : i64, scratch_operands = 0 : i64, tpu.core_type = #tpu.core_type<tc>} {
    %c0 = arith.constant 0 : index
    %c0_0 = arith.constant 0 : index
    %0 = vector.load %arg0[%c0, %c0_0] : memref<16x32xf32, #tpu.memory_space<vmem>>, vector<16x32xf32>
    %1 = tpu.iota {dimensions = array<i32: 0>} : vector<8x8xi32>
    %2 = tpu.iota {dimensions = array<i32: 1>} : vector<8x8xi32>
    %3 = arith.cmpi sge, %1, %2 : vector<8x8xi32>
    %cst = arith.constant 0.000000e+00 : f32
    %cst_1 = arith.constant -1.000000e+09 : f32
    %4 = vector.broadcast %cst : f32 to vector<8x8xf32>
    %5 = vector.broadcast %cst_1 : f32 to vector<8x8xf32>
    %6 = arith.select %3, %4, %5 : vector<8x8xi1>, vector<8x8xf32>
    %c0_2 = arith.constant 0 : index
    %c0_3 = arith.constant 0 : index
    %7 = vector.load %arg1[%c0_2, %c0_3] : memref<2x8xf32, #tpu.memory_space<vmem>>, vector<2x8xf32>
    %8 = vector.shape_cast %7 : vector<2x8xf32> to vector<2x1x8xf32>
    %9 = vector.shape_cast %6 : vector<8x8xf32> to vector<1x8x8xf32>
    %10 = vector.broadcast %8 : vector<2x1x8xf32> to vector<2x8x8xf32>
    %11 = vector.broadcast %9 : vector<1x8x8xf32> to vector<2x8x8xf32>
    %12 = arith.addf %10, %11 : vector<2x8x8xf32>
    %c0_4 = arith.constant 0 : index
    %c0_5 = arith.constant 0 : index
    %13 = vector.load %arg2[%c0_4, %c0_5] : memref<408x128xf32, #tpu.memory_space<vmem>>, vector<8x128xf32>
    %c8 = arith.constant 8 : index
    %c0_6 = arith.constant 0 : index
    %14 = vector.load %arg2[%c8, %c0_6] : memref<408x128xf32, #tpu.memory_space<vmem>>, vector<32x128xf32>
    %c40 = arith.constant 40 : index
    %c0_7 = arith.constant 0 : index
    %15 = vector.load %arg2[%c40, %c0_7] : memref<408x128xf32, #tpu.memory_space<vmem>>, vector<32x128xf32>
    %c72 = arith.constant 72 : index
    %c0_8 = arith.constant 0 : index
    %16 = vector.load %arg2[%c72, %c0_8] : memref<408x128xf32, #tpu.memory_space<vmem>>, vector<128x32xf32>
    %17 = vector.extract_strided_slice %13 {offsets = [0, 0], sizes = [1, 32], strides = [1, 1]} : vector<8x128xf32> to vector<1x32xf32>
    %18 = vector.extract_strided_slice %13 {offsets = [1, 0], sizes = [1, 32], strides = [1, 1]} : vector<8x128xf32> to vector<1x32xf32>
    %19 = vector.extract_strided_slice %13 {offsets = [2, 0], sizes = [1, 32], strides = [1, 1]} : vector<8x128xf32> to vector<1x32xf32>
    %20 = vector.extract_strided_slice %13 {offsets = [3, 0], sizes = [1, 32], strides = [1, 1]} : vector<8x128xf32> to vector<1x32xf32>
    %21 = vector.extract_strided_slice %13 {offsets = [4, 0], sizes = [1, 32], strides = [1, 1]} : vector<8x128xf32> to vector<1x32xf32>
    %22 = vector.extract_strided_slice %13 {offsets = [5, 0], sizes = [1, 32], strides = [1, 1]} : vector<8x128xf32> to vector<1x32xf32>
    %23 = vector.extract_strided_slice %13 {offsets = [6, 0], sizes = [1, 128], strides = [1, 1]} : vector<8x128xf32> to vector<1x128xf32>
    %24 = vector.extract_strided_slice %13 {offsets = [7, 0], sizes = [1, 96], strides = [1, 1]} : vector<8x128xf32> to vector<1x96xf32>
    %25 = vector.extract_strided_slice %14 {offsets = [0, 0], sizes = [32, 96], strides = [1, 1]} : vector<32x128xf32> to vector<32x96xf32>
    %26 = vector.extract_strided_slice %14 {offsets = [0, 96], sizes = [32, 32], strides = [1, 1]} : vector<32x128xf32> to vector<32x32xf32>
    %cst_9 = arith.constant dense<0.000000e+00> : vector<16xf32>
    %27 = vector.multi_reduction <add>, %0, %cst_9 [1] : vector<16x32xf32> to vector<16xf32>
    %28 = vector.shape_cast %27 : vector<16xf32> to vector<16x1xf32>
    %cst_10 = arith.constant 3.200000e+01 : f32
    %29 = vector.broadcast %cst_10 : f32 to vector<16x1xf32>
    %30 = arith.divf %28, %29 : vector<16x1xf32>
    %31 = vector.broadcast %30 : vector<16x1xf32> to vector<16x32xf32>
    %32 = arith.subf %0, %31 : vector<16x32xf32>
    %33 = arith.mulf %32, %32 : vector<16x32xf32>
    %cst_11 = arith.constant dense<0.000000e+00> : vector<16xf32>
    %34 = vector.multi_reduction <add>, %33, %cst_11 [1] : vector<16x32xf32> to vector<16xf32>
    %35 = vector.shape_cast %34 : vector<16xf32> to vector<16x1xf32>
    %cst_12 = arith.constant 3.200000e+01 : f32
    %36 = vector.broadcast %cst_12 : f32 to vector<16x1xf32>
    %37 = arith.divf %35, %36 : vector<16x1xf32>
    %cst_13 = arith.constant 9.99999974E-6 : f32
    %38 = vector.broadcast %cst_13 : f32 to vector<16x1xf32>
    %39 = arith.addf %37, %38 : vector<16x1xf32>
    %40 = math.rsqrt %39 : vector<16x1xf32>
    %41 = vector.broadcast %40 : vector<16x1xf32> to vector<16x32xf32>
    %42 = arith.mulf %32, %41 : vector<16x32xf32>
    %43 = vector.broadcast %17 : vector<1x32xf32> to vector<16x32xf32>
    %44 = arith.mulf %42, %43 : vector<16x32xf32>
    %45 = vector.broadcast %18 : vector<1x32xf32> to vector<16x32xf32>
    %46 = arith.addf %44, %45 : vector<16x32xf32>
    %cst_14 = arith.constant dense<0.000000e+00> : vector<16x96xf32>
    %47 = tpu.matmul %46, %25, %cst_14 {dimension_numbers = #tpu.dot_dimension_numbers<[1], [0], [0], [1], [0, 0, 1, 1], [], []>} : vector<16x32xf32>, vector<32x96xf32>, vector<16x96xf32> -> vector<16x96xf32>
    %48 = vector.broadcast %24 : vector<1x96xf32> to vector<16x96xf32>
    %49 = arith.addf %47, %48 : vector<16x96xf32>
    %50 = vector.shape_cast %49 : vector<16x96xf32> to vector<2x8x96xf32>
    %51 = vector.extract_strided_slice %50 {offsets = [0, 0, 0], sizes = [2, 8, 16], strides = [1, 1, 1]} : vector<2x8x96xf32> to vector<2x8x16xf32>
    %52 = vector.extract_strided_slice %50 {offsets = [0, 0, 32], sizes = [2, 8, 16], strides = [1, 1, 1]} : vector<2x8x96xf32> to vector<2x8x16xf32>
    %53 = vector.extract_strided_slice %50 {offsets = [0, 0, 64], sizes = [2, 8, 16], strides = [1, 1, 1]} : vector<2x8x96xf32> to vector<2x8x16xf32>
    "tpu.trace_start"() <{level = 10 : i32, message = "bqe,bke->bqk"}> : () -> ()
    %cst_15 = arith.constant dense<0.000000e+00> : vector<2x8x8xf32>
    %54 = tpu.matmul %51, %52, %cst_15 {dimension_numbers = #tpu.dot_dimension_numbers<[2], [2], [1], [1], [0, 0, 0, 1, 1, 1], [0], [0]>} : vector<2x8x16xf32>, vector<2x8x16xf32>, vector<2x8x8xf32> -> vector<2x8x8xf32>
    "tpu.trace_stop"() : () -> ()
    %cst_16 = arith.constant 2.500000e-01 : f32
    %55 = vector.broadcast %cst_16 : f32 to vector<2x8x8xf32>
    %56 = arith.mulf %54, %55 : vector<2x8x8xf32>
    %57 = arith.addf %56, %12 : vector<2x8x8xf32>
    %cst_17 = arith.constant dense<0xFF800000> : vector<2x8xf32>
    %58 = vector.multi_reduction <maximumf>, %57, %cst_17 [2] : vector<2x8x8xf32> to vector<2x8xf32>
    %59 = vector.shape_cast %58 : vector<2x8xf32> to vector<2x8x1xf32>
    %60 = vector.broadcast %59 : vector<2x8x1xf32> to vector<2x8x8xf32>
    %61 = arith.subf %57, %60 : vector<2x8x8xf32>
    %62 = math.exp %61 : vector<2x8x8xf32>
    %cst_18 = arith.constant dense<0.000000e+00> : vector<2x8xf32>
    %63 = vector.multi_reduction <add>, %62, %cst_18 [2] : vector<2x8x8xf32> to vector<2x8xf32>
    %64 = vector.shape_cast %63 : vector<2x8xf32> to vector<2x8x1xf32>
    %65 = vector.broadcast %64 : vector<2x8x1xf32> to vector<2x8x8xf32>
    %66 = arith.divf %62, %65 : vector<2x8x8xf32>
    "tpu.trace_start"() <{level = 10 : i32, message = "bqk,bke->bqe"}> : () -> ()
    %cst_19 = arith.constant dense<0.000000e+00> : vector<2x8x16xf32>
    %67 = tpu.matmul %66, %53, %cst_19 {dimension_numbers = #tpu.dot_dimension_numbers<[2], [1], [1], [2], [0, 0, 0, 1, 1, 2], [0], [0]>} : vector<2x8x8xf32>, vector<2x8x16xf32>, vector<2x8x16xf32> -> vector<2x8x16xf32>
    "tpu.trace_stop"() : () -> ()
    %68 = vector.extract_strided_slice %50 {offsets = [0, 0, 16], sizes = [2, 8, 16], strides = [1, 1, 1]} : vector<2x8x96xf32> to vector<2x8x16xf32>
    %69 = vector.extract_strided_slice %50 {offsets = [0, 0, 48], sizes = [2, 8, 16], strides = [1, 1, 1]} : vector<2x8x96xf32> to vector<2x8x16xf32>
    %70 = vector.extract_strided_slice %50 {offsets = [0, 0, 80], sizes = [2, 8, 16], strides = [1, 1, 1]} : vector<2x8x96xf32> to vector<2x8x16xf32>
    "tpu.trace_start"() <{level = 10 : i32, message = "bqe,bke->bqk"}> : () -> ()
    %cst_20 = arith.constant dense<0.000000e+00> : vector<2x8x8xf32>
    %71 = tpu.matmul %68, %69, %cst_20 {dimension_numbers = #tpu.dot_dimension_numbers<[2], [2], [1], [1], [0, 0, 0, 1, 1, 1], [0], [0]>} : vector<2x8x16xf32>, vector<2x8x16xf32>, vector<2x8x8xf32> -> vector<2x8x8xf32>
    "tpu.trace_stop"() : () -> ()
    %cst_21 = arith.constant 2.500000e-01 : f32
    %72 = vector.broadcast %cst_21 : f32 to vector<2x8x8xf32>
    %73 = arith.mulf %71, %72 : vector<2x8x8xf32>
    %74 = arith.addf %73, %12 : vector<2x8x8xf32>
    %cst_22 = arith.constant dense<0xFF800000> : vector<2x8xf32>
    %75 = vector.multi_reduction <maximumf>, %74, %cst_22 [2] : vector<2x8x8xf32> to vector<2x8xf32>
    %76 = vector.shape_cast %75 : vector<2x8xf32> to vector<2x8x1xf32>
    %77 = vector.broadcast %76 : vector<2x8x1xf32> to vector<2x8x8xf32>
    %78 = arith.subf %74, %77 : vector<2x8x8xf32>
    %79 = math.exp %78 : vector<2x8x8xf32>
    %cst_23 = arith.constant dense<0.000000e+00> : vector<2x8xf32>
    %80 = vector.multi_reduction <add>, %79, %cst_23 [2] : vector<2x8x8xf32> to vector<2x8xf32>
    %81 = vector.shape_cast %80 : vector<2x8xf32> to vector<2x8x1xf32>
    %82 = vector.broadcast %81 : vector<2x8x1xf32> to vector<2x8x8xf32>
    %83 = arith.divf %79, %82 : vector<2x8x8xf32>
    "tpu.trace_start"() <{level = 10 : i32, message = "bqk,bke->bqe"}> : () -> ()
    %cst_24 = arith.constant dense<0.000000e+00> : vector<2x8x16xf32>
    %84 = tpu.matmul %83, %70, %cst_24 {dimension_numbers = #tpu.dot_dimension_numbers<[2], [1], [1], [2], [0, 0, 0, 1, 1, 2], [0], [0]>} : vector<2x8x8xf32>, vector<2x8x16xf32>, vector<2x8x16xf32> -> vector<2x8x16xf32>
    "tpu.trace_stop"() : () -> ()
    %85 = tpu.concatenate %67, %84 in 2 : vector<2x8x16xf32>, vector<2x8x16xf32> -> vector<2x8x32xf32>
    %86 = vector.shape_cast %85 : vector<2x8x32xf32> to vector<16x32xf32>
    %cst_25 = arith.constant dense<0.000000e+00> : vector<16x32xf32>
    %87 = tpu.matmul %86, %26, %cst_25 {dimension_numbers = #tpu.dot_dimension_numbers<[1], [0], [0], [1], [0, 0, 1, 1], [], []>} : vector<16x32xf32>, vector<32x32xf32>, vector<16x32xf32> -> vector<16x32xf32>
    %88 = arith.addf %0, %87 : vector<16x32xf32>
    %89 = vector.broadcast %19 : vector<1x32xf32> to vector<16x32xf32>
    %90 = arith.addf %88, %89 : vector<16x32xf32>
    %cst_26 = arith.constant dense<0.000000e+00> : vector<16xf32>
    %91 = vector.multi_reduction <add>, %90, %cst_26 [1] : vector<16x32xf32> to vector<16xf32>
    %92 = vector.shape_cast %91 : vector<16xf32> to vector<16x1xf32>
    %cst_27 = arith.constant 3.200000e+01 : f32
    %93 = vector.broadcast %cst_27 : f32 to vector<16x1xf32>
    %94 = arith.divf %92, %93 : vector<16x1xf32>
    %95 = vector.broadcast %94 : vector<16x1xf32> to vector<16x32xf32>
    %96 = arith.subf %90, %95 : vector<16x32xf32>
    %97 = arith.mulf %96, %96 : vector<16x32xf32>
    %cst_28 = arith.constant dense<0.000000e+00> : vector<16xf32>
    %98 = vector.multi_reduction <add>, %97, %cst_28 [1] : vector<16x32xf32> to vector<16xf32>
    %99 = vector.shape_cast %98 : vector<16xf32> to vector<16x1xf32>
    %cst_29 = arith.constant 3.200000e+01 : f32
    %100 = vector.broadcast %cst_29 : f32 to vector<16x1xf32>
    %101 = arith.divf %99, %100 : vector<16x1xf32>
    %cst_30 = arith.constant 9.99999974E-6 : f32
    %102 = vector.broadcast %cst_30 : f32 to vector<16x1xf32>
    %103 = arith.addf %101, %102 : vector<16x1xf32>
    %104 = math.rsqrt %103 : vector<16x1xf32>
    %105 = vector.broadcast %104 : vector<16x1xf32> to vector<16x32xf32>
    %106 = arith.mulf %96, %105 : vector<16x32xf32>
    %107 = vector.broadcast %20 : vector<1x32xf32> to vector<16x32xf32>
    %108 = arith.mulf %106, %107 : vector<16x32xf32>
    %109 = vector.broadcast %21 : vector<1x32xf32> to vector<16x32xf32>
    %110 = arith.addf %108, %109 : vector<16x32xf32>
    %cst_31 = arith.constant dense<0.000000e+00> : vector<16x128xf32>
    %111 = tpu.matmul %110, %15, %cst_31 {dimension_numbers = #tpu.dot_dimension_numbers<[1], [0], [0], [1], [0, 0, 1, 1], [], []>} : vector<16x32xf32>, vector<32x128xf32>, vector<16x128xf32> -> vector<16x128xf32>
    %112 = vector.broadcast %23 : vector<1x128xf32> to vector<16x128xf32>
    %113 = arith.addf %111, %112 : vector<16x128xf32>
    %cst_32 = arith.constant 5.000000e-01 : f32
    %114 = vector.broadcast %cst_32 : f32 to vector<16x128xf32>
    %115 = arith.mulf %114, %113 : vector<16x128xf32>
    %cst_33 = arith.constant 4.471500e-02 : f32
    %116 = vector.broadcast %cst_33 : f32 to vector<16x128xf32>
    %117 = arith.mulf %116, %113 : vector<16x128xf32>
    %118 = arith.mulf %117, %113 : vector<16x128xf32>
    %119 = arith.mulf %118, %113 : vector<16x128xf32>
    %120 = arith.addf %113, %119 : vector<16x128xf32>
    %cst_34 = arith.constant 0.797884583 : f32
    %121 = vector.broadcast %cst_34 : f32 to vector<16x128xf32>
    %122 = arith.mulf %121, %120 : vector<16x128xf32>
    %123 = math.tanh %122 : vector<16x128xf32>
    %cst_35 = arith.constant 1.000000e+00 : f32
    %124 = vector.broadcast %cst_35 : f32 to vector<16x128xf32>
    %125 = arith.addf %124, %123 : vector<16x128xf32>
    %126 = arith.mulf %115, %125 : vector<16x128xf32>
    %cst_36 = arith.constant dense<0.000000e+00> : vector<16x32xf32>
    %127 = tpu.matmul %126, %16, %cst_36 {dimension_numbers = #tpu.dot_dimension_numbers<[1], [0], [0], [1], [0, 0, 1, 1], [], []>} : vector<16x128xf32>, vector<128x32xf32>, vector<16x32xf32> -> vector<16x32xf32>
    %128 = arith.addf %90, %127 : vector<16x32xf32>
    %129 = vector.broadcast %22 : vector<1x32xf32> to vector<16x32xf32>
    %130 = arith.addf %128, %129 : vector<16x32xf32>
    %c200 = arith.constant 200 : index
    %c0_37 = arith.constant 0 : index
    %131 = vector.load %arg2[%c200, %c0_37] : memref<408x128xf32, #tpu.memory_space<vmem>>, vector<8x128xf32>
    %c208 = arith.constant 208 : index
    %c0_38 = arith.constant 0 : index
    %132 = vector.load %arg2[%c208, %c0_38] : memref<408x128xf32, #tpu.memory_space<vmem>>, vector<32x128xf32>
    %c240 = arith.constant 240 : index
    %c0_39 = arith.constant 0 : index
    %133 = vector.load %arg2[%c240, %c0_39] : memref<408x128xf32, #tpu.memory_space<vmem>>, vector<32x128xf32>
    %c272 = arith.constant 272 : index
    %c0_40 = arith.constant 0 : index
    %134 = vector.load %arg2[%c272, %c0_40] : memref<408x128xf32, #tpu.memory_space<vmem>>, vector<128x32xf32>
    %135 = vector.extract_strided_slice %131 {offsets = [0, 0], sizes = [1, 32], strides = [1, 1]} : vector<8x128xf32> to vector<1x32xf32>
    %136 = vector.extract_strided_slice %131 {offsets = [1, 0], sizes = [1, 32], strides = [1, 1]} : vector<8x128xf32> to vector<1x32xf32>
    %137 = vector.extract_strided_slice %131 {offsets = [2, 0], sizes = [1, 32], strides = [1, 1]} : vector<8x128xf32> to vector<1x32xf32>
    %138 = vector.extract_strided_slice %131 {offsets = [3, 0], sizes = [1, 32], strides = [1, 1]} : vector<8x128xf32> to vector<1x32xf32>
    %139 = vector.extract_strided_slice %131 {offsets = [4, 0], sizes = [1, 32], strides = [1, 1]} : vector<8x128xf32> to vector<1x32xf32>
    %140 = vector.extract_strided_slice %131 {offsets = [5, 0], sizes = [1, 32], strides = [1, 1]} : vector<8x128xf32> to vector<1x32xf32>
    %141 = vector.extract_strided_slice %131 {offsets = [6, 0], sizes = [1, 128], strides = [1, 1]} : vector<8x128xf32> to vector<1x128xf32>
    %142 = vector.extract_strided_slice %131 {offsets = [7, 0], sizes = [1, 96], strides = [1, 1]} : vector<8x128xf32> to vector<1x96xf32>
    %143 = vector.extract_strided_slice %132 {offsets = [0, 0], sizes = [32, 96], strides = [1, 1]} : vector<32x128xf32> to vector<32x96xf32>
    %144 = vector.extract_strided_slice %132 {offsets = [0, 96], sizes = [32, 32], strides = [1, 1]} : vector<32x128xf32> to vector<32x32xf32>
    %cst_41 = arith.constant dense<0.000000e+00> : vector<16xf32>
    %145 = vector.multi_reduction <add>, %130, %cst_41 [1] : vector<16x32xf32> to vector<16xf32>
    %146 = vector.shape_cast %145 : vector<16xf32> to vector<16x1xf32>
    %cst_42 = arith.constant 3.200000e+01 : f32
    %147 = vector.broadcast %cst_42 : f32 to vector<16x1xf32>
    %148 = arith.divf %146, %147 : vector<16x1xf32>
    %149 = vector.broadcast %148 : vector<16x1xf32> to vector<16x32xf32>
    %150 = arith.subf %130, %149 : vector<16x32xf32>
    %151 = arith.mulf %150, %150 : vector<16x32xf32>
    %cst_43 = arith.constant dense<0.000000e+00> : vector<16xf32>
    %152 = vector.multi_reduction <add>, %151, %cst_43 [1] : vector<16x32xf32> to vector<16xf32>
    %153 = vector.shape_cast %152 : vector<16xf32> to vector<16x1xf32>
    %cst_44 = arith.constant 3.200000e+01 : f32
    %154 = vector.broadcast %cst_44 : f32 to vector<16x1xf32>
    %155 = arith.divf %153, %154 : vector<16x1xf32>
    %cst_45 = arith.constant 9.99999974E-6 : f32
    %156 = vector.broadcast %cst_45 : f32 to vector<16x1xf32>
    %157 = arith.addf %155, %156 : vector<16x1xf32>
    %158 = math.rsqrt %157 : vector<16x1xf32>
    %159 = vector.broadcast %158 : vector<16x1xf32> to vector<16x32xf32>
    %160 = arith.mulf %150, %159 : vector<16x32xf32>
    %161 = vector.broadcast %135 : vector<1x32xf32> to vector<16x32xf32>
    %162 = arith.mulf %160, %161 : vector<16x32xf32>
    %163 = vector.broadcast %136 : vector<1x32xf32> to vector<16x32xf32>
    %164 = arith.addf %162, %163 : vector<16x32xf32>
    %cst_46 = arith.constant dense<0.000000e+00> : vector<16x96xf32>
    %165 = tpu.matmul %164, %143, %cst_46 {dimension_numbers = #tpu.dot_dimension_numbers<[1], [0], [0], [1], [0, 0, 1, 1], [], []>} : vector<16x32xf32>, vector<32x96xf32>, vector<16x96xf32> -> vector<16x96xf32>
    %166 = vector.broadcast %142 : vector<1x96xf32> to vector<16x96xf32>
    %167 = arith.addf %165, %166 : vector<16x96xf32>
    %168 = vector.shape_cast %167 : vector<16x96xf32> to vector<2x8x96xf32>
    %169 = vector.extract_strided_slice %168 {offsets = [0, 0, 0], sizes = [2, 8, 16], strides = [1, 1, 1]} : vector<2x8x96xf32> to vector<2x8x16xf32>
    %170 = vector.extract_strided_slice %168 {offsets = [0, 0, 32], sizes = [2, 8, 16], strides = [1, 1, 1]} : vector<2x8x96xf32> to vector<2x8x16xf32>
    %171 = vector.extract_strided_slice %168 {offsets = [0, 0, 64], sizes = [2, 8, 16], strides = [1, 1, 1]} : vector<2x8x96xf32> to vector<2x8x16xf32>
    "tpu.trace_start"() <{level = 10 : i32, message = "bqe,bke->bqk"}> : () -> ()
    %cst_47 = arith.constant dense<0.000000e+00> : vector<2x8x8xf32>
    %172 = tpu.matmul %169, %170, %cst_47 {dimension_numbers = #tpu.dot_dimension_numbers<[2], [2], [1], [1], [0, 0, 0, 1, 1, 1], [0], [0]>} : vector<2x8x16xf32>, vector<2x8x16xf32>, vector<2x8x8xf32> -> vector<2x8x8xf32>
    "tpu.trace_stop"() : () -> ()
    %cst_48 = arith.constant 2.500000e-01 : f32
    %173 = vector.broadcast %cst_48 : f32 to vector<2x8x8xf32>
    %174 = arith.mulf %172, %173 : vector<2x8x8xf32>
    %175 = arith.addf %174, %12 : vector<2x8x8xf32>
    %cst_49 = arith.constant dense<0xFF800000> : vector<2x8xf32>
    %176 = vector.multi_reduction <maximumf>, %175, %cst_49 [2] : vector<2x8x8xf32> to vector<2x8xf32>
    %177 = vector.shape_cast %176 : vector<2x8xf32> to vector<2x8x1xf32>
    %178 = vector.broadcast %177 : vector<2x8x1xf32> to vector<2x8x8xf32>
    %179 = arith.subf %175, %178 : vector<2x8x8xf32>
    %180 = math.exp %179 : vector<2x8x8xf32>
    %cst_50 = arith.constant dense<0.000000e+00> : vector<2x8xf32>
    %181 = vector.multi_reduction <add>, %180, %cst_50 [2] : vector<2x8x8xf32> to vector<2x8xf32>
    %182 = vector.shape_cast %181 : vector<2x8xf32> to vector<2x8x1xf32>
    %183 = vector.broadcast %182 : vector<2x8x1xf32> to vector<2x8x8xf32>
    %184 = arith.divf %180, %183 : vector<2x8x8xf32>
    "tpu.trace_start"() <{level = 10 : i32, message = "bqk,bke->bqe"}> : () -> ()
    %cst_51 = arith.constant dense<0.000000e+00> : vector<2x8x16xf32>
    %185 = tpu.matmul %184, %171, %cst_51 {dimension_numbers = #tpu.dot_dimension_numbers<[2], [1], [1], [2], [0, 0, 0, 1, 1, 2], [0], [0]>} : vector<2x8x8xf32>, vector<2x8x16xf32>, vector<2x8x16xf32> -> vector<2x8x16xf32>
    "tpu.trace_stop"() : () -> ()
    %186 = vector.extract_strided_slice %168 {offsets = [0, 0, 16], sizes = [2, 8, 16], strides = [1, 1, 1]} : vector<2x8x96xf32> to vector<2x8x16xf32>
    %187 = vector.extract_strided_slice %168 {offsets = [0, 0, 48], sizes = [2, 8, 16], strides = [1, 1, 1]} : vector<2x8x96xf32> to vector<2x8x16xf32>
    %188 = vector.extract_strided_slice %168 {offsets = [0, 0, 80], sizes = [2, 8, 16], strides = [1, 1, 1]} : vector<2x8x96xf32> to vector<2x8x16xf32>
    "tpu.trace_start"() <{level = 10 : i32, message = "bqe,bke->bqk"}> : () -> ()
    %cst_52 = arith.constant dense<0.000000e+00> : vector<2x8x8xf32>
    %189 = tpu.matmul %186, %187, %cst_52 {dimension_numbers = #tpu.dot_dimension_numbers<[2], [2], [1], [1], [0, 0, 0, 1, 1, 1], [0], [0]>} : vector<2x8x16xf32>, vector<2x8x16xf32>, vector<2x8x8xf32> -> vector<2x8x8xf32>
    "tpu.trace_stop"() : () -> ()
    %cst_53 = arith.constant 2.500000e-01 : f32
    %190 = vector.broadcast %cst_53 : f32 to vector<2x8x8xf32>
    %191 = arith.mulf %189, %190 : vector<2x8x8xf32>
    %192 = arith.addf %191, %12 : vector<2x8x8xf32>
    %cst_54 = arith.constant dense<0xFF800000> : vector<2x8xf32>
    %193 = vector.multi_reduction <maximumf>, %192, %cst_54 [2] : vector<2x8x8xf32> to vector<2x8xf32>
    %194 = vector.shape_cast %193 : vector<2x8xf32> to vector<2x8x1xf32>
    %195 = vector.broadcast %194 : vector<2x8x1xf32> to vector<2x8x8xf32>
    %196 = arith.subf %192, %195 : vector<2x8x8xf32>
    %197 = math.exp %196 : vector<2x8x8xf32>
    %cst_55 = arith.constant dense<0.000000e+00> : vector<2x8xf32>
    %198 = vector.multi_reduction <add>, %197, %cst_55 [2] : vector<2x8x8xf32> to vector<2x8xf32>
    %199 = vector.shape_cast %198 : vector<2x8xf32> to vector<2x8x1xf32>
    %200 = vector.broadcast %199 : vector<2x8x1xf32> to vector<2x8x8xf32>
    %201 = arith.divf %197, %200 : vector<2x8x8xf32>
    "tpu.trace_start"() <{level = 10 : i32, message = "bqk,bke->bqe"}> : () -> ()
    %cst_56 = arith.constant dense<0.000000e+00> : vector<2x8x16xf32>
    %202 = tpu.matmul %201, %188, %cst_56 {dimension_numbers = #tpu.dot_dimension_numbers<[2], [1], [1], [2], [0, 0, 0, 1, 1, 2], [0], [0]>} : vector<2x8x8xf32>, vector<2x8x16xf32>, vector<2x8x16xf32> -> vector<2x8x16xf32>
    "tpu.trace_stop"() : () -> ()
    %203 = tpu.concatenate %185, %202 in 2 : vector<2x8x16xf32>, vector<2x8x16xf32> -> vector<2x8x32xf32>
    %204 = vector.shape_cast %203 : vector<2x8x32xf32> to vector<16x32xf32>
    %cst_57 = arith.constant dense<0.000000e+00> : vector<16x32xf32>
    %205 = tpu.matmul %204, %144, %cst_57 {dimension_numbers = #tpu.dot_dimension_numbers<[1], [0], [0], [1], [0, 0, 1, 1], [], []>} : vector<16x32xf32>, vector<32x32xf32>, vector<16x32xf32> -> vector<16x32xf32>
    %206 = arith.addf %130, %205 : vector<16x32xf32>
    %207 = vector.broadcast %137 : vector<1x32xf32> to vector<16x32xf32>
    %208 = arith.addf %206, %207 : vector<16x32xf32>
    %cst_58 = arith.constant dense<0.000000e+00> : vector<16xf32>
    %209 = vector.multi_reduction <add>, %208, %cst_58 [1] : vector<16x32xf32> to vector<16xf32>
    %210 = vector.shape_cast %209 : vector<16xf32> to vector<16x1xf32>
    %cst_59 = arith.constant 3.200000e+01 : f32
    %211 = vector.broadcast %cst_59 : f32 to vector<16x1xf32>
    %212 = arith.divf %210, %211 : vector<16x1xf32>
    %213 = vector.broadcast %212 : vector<16x1xf32> to vector<16x32xf32>
    %214 = arith.subf %208, %213 : vector<16x32xf32>
    %215 = arith.mulf %214, %214 : vector<16x32xf32>
    %cst_60 = arith.constant dense<0.000000e+00> : vector<16xf32>
    %216 = vector.multi_reduction <add>, %215, %cst_60 [1] : vector<16x32xf32> to vector<16xf32>
    %217 = vector.shape_cast %216 : vector<16xf32> to vector<16x1xf32>
    %cst_61 = arith.constant 3.200000e+01 : f32
    %218 = vector.broadcast %cst_61 : f32 to vector<16x1xf32>
    %219 = arith.divf %217, %218 : vector<16x1xf32>
    %cst_62 = arith.constant 9.99999974E-6 : f32
    %220 = vector.broadcast %cst_62 : f32 to vector<16x1xf32>
    %221 = arith.addf %219, %220 : vector<16x1xf32>
    %222 = math.rsqrt %221 : vector<16x1xf32>
    %223 = vector.broadcast %222 : vector<16x1xf32> to vector<16x32xf32>
    %224 = arith.mulf %214, %223 : vector<16x32xf32>
    %225 = vector.broadcast %138 : vector<1x32xf32> to vector<16x32xf32>
    %226 = arith.mulf %224, %225 : vector<16x32xf32>
    %227 = vector.broadcast %139 : vector<1x32xf32> to vector<16x32xf32>
    %228 = arith.addf %226, %227 : vector<16x32xf32>
    %cst_63 = arith.constant dense<0.000000e+00> : vector<16x128xf32>
    %229 = tpu.matmul %228, %133, %cst_63 {dimension_numbers = #tpu.dot_dimension_numbers<[1], [0], [0], [1], [0, 0, 1, 1], [], []>} : vector<16x32xf32>, vector<32x128xf32>, vector<16x128xf32> -> vector<16x128xf32>
    %230 = vector.broadcast %141 : vector<1x128xf32> to vector<16x128xf32>
    %231 = arith.addf %229, %230 : vector<16x128xf32>
    %cst_64 = arith.constant 5.000000e-01 : f32
    %232 = vector.broadcast %cst_64 : f32 to vector<16x128xf32>
    %233 = arith.mulf %232, %231 : vector<16x128xf32>
    %cst_65 = arith.constant 4.471500e-02 : f32
    %234 = vector.broadcast %cst_65 : f32 to vector<16x128xf32>
    %235 = arith.mulf %234, %231 : vector<16x128xf32>
    %236 = arith.mulf %235, %231 : vector<16x128xf32>
    %237 = arith.mulf %236, %231 : vector<16x128xf32>
    %238 = arith.addf %231, %237 : vector<16x128xf32>
    %cst_66 = arith.constant 0.797884583 : f32
    %239 = vector.broadcast %cst_66 : f32 to vector<16x128xf32>
    %240 = arith.mulf %239, %238 : vector<16x128xf32>
    %241 = math.tanh %240 : vector<16x128xf32>
    %cst_67 = arith.constant 1.000000e+00 : f32
    %242 = vector.broadcast %cst_67 : f32 to vector<16x128xf32>
    %243 = arith.addf %242, %241 : vector<16x128xf32>
    %244 = arith.mulf %233, %243 : vector<16x128xf32>
    %cst_68 = arith.constant dense<0.000000e+00> : vector<16x32xf32>
    %245 = tpu.matmul %244, %134, %cst_68 {dimension_numbers = #tpu.dot_dimension_numbers<[1], [0], [0], [1], [0, 0, 1, 1], [], []>} : vector<16x128xf32>, vector<128x32xf32>, vector<16x32xf32> -> vector<16x32xf32>
    %246 = arith.addf %208, %245 : vector<16x32xf32>
    %247 = vector.broadcast %140 : vector<1x32xf32> to vector<16x32xf32>
    %248 = arith.addf %246, %247 : vector<16x32xf32>
    %c400 = arith.constant 400 : index
    %c0_69 = arith.constant 0 : index
    %249 = vector.load %arg2[%c400, %c0_69] : memref<408x128xf32, #tpu.memory_space<vmem>>, vector<8x128xf32>
    %250 = vector.shape_cast %248 : vector<16x32xf32> to vector<2x8x32xf32>
    %251 = vector.extract_strided_slice %250 {offsets = [0, 7, 0], sizes = [2, 1, 32], strides = [1, 1, 1]} : vector<2x8x32xf32> to vector<2x1x32xf32>
    %252 = vector.shape_cast %251 : vector<2x1x32xf32> to vector<2x32xf32>
    %253 = vector.extract_strided_slice %249 {offsets = [0, 0], sizes = [1, 32], strides = [1, 1]} : vector<8x128xf32> to vector<1x32xf32>
    %254 = vector.extract_strided_slice %249 {offsets = [1, 0], sizes = [1, 32], strides = [1, 1]} : vector<8x128xf32> to vector<1x32xf32>
    %cst_70 = arith.constant dense<0.000000e+00> : vector<2xf32>
    %255 = vector.multi_reduction <add>, %252, %cst_70 [1] : vector<2x32xf32> to vector<2xf32>
    %256 = vector.shape_cast %255 : vector<2xf32> to vector<2x1xf32>
    %cst_71 = arith.constant 3.200000e+01 : f32
    %257 = vector.broadcast %cst_71 : f32 to vector<2x1xf32>
    %258 = arith.divf %256, %257 : vector<2x1xf32>
    %259 = vector.broadcast %258 : vector<2x1xf32> to vector<2x32xf32>
    %260 = arith.subf %252, %259 : vector<2x32xf32>
    %261 = arith.mulf %260, %260 : vector<2x32xf32>
    %cst_72 = arith.constant dense<0.000000e+00> : vector<2xf32>
    %262 = vector.multi_reduction <add>, %261, %cst_72 [1] : vector<2x32xf32> to vector<2xf32>
    %263 = vector.shape_cast %262 : vector<2xf32> to vector<2x1xf32>
    %cst_73 = arith.constant 3.200000e+01 : f32
    %264 = vector.broadcast %cst_73 : f32 to vector<2x1xf32>
    %265 = arith.divf %263, %264 : vector<2x1xf32>
    %cst_74 = arith.constant 9.99999974E-6 : f32
    %266 = vector.broadcast %cst_74 : f32 to vector<2x1xf32>
    %267 = arith.addf %265, %266 : vector<2x1xf32>
    %268 = math.rsqrt %267 : vector<2x1xf32>
    %269 = vector.broadcast %268 : vector<2x1xf32> to vector<2x32xf32>
    %270 = arith.mulf %260, %269 : vector<2x32xf32>
    %271 = vector.broadcast %253 : vector<1x32xf32> to vector<2x32xf32>
    %272 = arith.mulf %270, %271 : vector<2x32xf32>
    %273 = vector.broadcast %254 : vector<1x32xf32> to vector<2x32xf32>
    %274 = arith.addf %272, %273 : vector<2x32xf32>
    %275 = vector.extract_strided_slice %249 {offsets = [2, 0], sizes = [1, 32], strides = [1, 1]} : vector<8x128xf32> to vector<1x32xf32>
    %276 = vector.broadcast %275 : vector<1x32xf32> to vector<2x32xf32>
    %277 = arith.mulf %274, %276 : vector<2x32xf32>
    %278 = vector.extract_strided_slice %249 {offsets = [3, 0], sizes = [1, 32], strides = [1, 1]} : vector<8x128xf32> to vector<1x32xf32>
    %279 = vector.broadcast %278 : vector<1x32xf32> to vector<2x32xf32>
    %280 = arith.addf %277, %279 : vector<2x32xf32>
    %cst_75 = arith.constant dense<0.000000e+00> : vector<2xf32>
    %281 = vector.multi_reduction <add>, %280, %cst_75 [1] : vector<2x32xf32> to vector<2xf32>
    %282 = vector.shape_cast %281 : vector<2xf32> to vector<2x1xf32>
    %283 = vector.shape_cast %282 : vector<2x1xf32> to vector<2x1xf32>
    %284 = vector.broadcast %283 : vector<2x1xf32> to vector<2x128xf32>
    %c0_76 = arith.constant 0 : index
    %c0_77 = arith.constant 0 : index
    %285 = vector.load %arg3[%c0_76, %c0_77] : memref<2x128xf32, #tpu.memory_space<vmem>>, vector<2x128xf32>
    tpu.vector_store %arg3[%c0_76, %c0_77], %284 {strides = array<i32>} : memref<2x128xf32, #tpu.memory_space<vmem>>, vector<2x128xf32>,
    return
  }
}

</mosaic_0001>

<bundles_post_ra>
// kernel: reward_model_forward.1
= control target key start
LH: loop header
LB: loop body
LE: loop exit
PB: predicated region body
PF: predicated region fallthrough
CT: control target
= control target key end

     0   :  { %8 = vsyncpa [#allocation3], 0  ;;  %s2926_s12 = smov [#allocation2]   ;;  %s3342_s0 = inlined_call_operand.vmem [shape: f32[16,32], index: 0, kind: input, shape index: {}]   ;;  %s3343_s1 = inlined_call_operand.vmem [shape: f32[2,8], index: 1, kind: input, shape index: {}]   ;;  %s3344_s2 = inlined_call_operand.hbm [shape: f32[408,128], index: 2, kind: input, shape index: {}]   ;;  %s3345_s3 = inlined_call_operand.vmem [shape: f32[2,128], index: 3, kind: output, shape index: {}]  }
   0x1   :  { %s18_s13 = sshll.u32 %s2926_s12, 4  ;;  %s19_s13 = int_to_ptr.vmem [resolvable:$true] %s18_s13 }
   0x2   :  { %s2912_s14 = scalar_lea.vmem %s19_s13, 6528  ;;  %p2917_p1 = scmp.lt.s32.totalorder %s19_s13, %s19_s13 }
   0x3   :  { %p2913_p0 = scmp.ne.s32.totalorder %s19_s13, %s2912_s14  ;;  %p2918_p2 = scmp.lt.s32.totalorder %s2912_s14, %s2912_s14 }
   0x5   :  { %p2919_p3 = por %p2918_p2, %p2917_p1 }
   0x7   :  { %p2920_p4 = pnand %p2919_p3, %p2913_p0 }
   0x9   :  { %2923 = shalt.err (!%p2920_p4)
}
   0xa   :  { %s2927_s15 = smov 128   ;;  %s2928_s16 = smov 8  }
   0xb   :  { %24 = dma.hbm_to_vmem [thread:$0]  %s3344_s2, 6528, %s19_s13, [#allocation3], %s2927_s15, %s2927_s15, %s2928_s16  }
   0xc   :  { %2924 = dma.done.wait [#allocation3], 6528  }
   0xd   :  { %2925 = vsyncadd [#allocation3], 4294960768  ;;  %vm97_vm0 = vcmask 261120   ;;  %v2966_v0 = vld [vmem:[%s3342_s0] sm:$0xff]  ;;  %v2971_v1 = vld [vmem:[%s3342_s0 + $0x8] sm:$0xff]  ;;  %v30_v23 = vlaneseq  ;;  %v2929_v39 = vmov 0.0  }
   0xe   :  { %v98_v2 = vsel %vm97_vm0, %v2966_v0, 0.0  ;;  %v101_v3 = vsel %vm97_vm0, %v2971_v1, 0.0  ;;  %v2981_v14 = vld [vmem:[#allocation2 + $0x20] sm:$0xff]  ;;  %v2983_v15 = vld [vmem:[#allocation2 + $0x18] sm:$0xff]  ;;  %v2987_v16 = vld [vmem:[#allocation2 + $0x10] sm:$0xff]  ;;  %2635 = vmatprep.subr.mxu0 %v2929_v39  ;;  %vm2930_vm1 = vmmov 0  }
   0xf   :  { %99 = vadd.xlane.f32.xlu0 %v98_v2  ;;  %2614 = vmatprep.subr.mxu1 %v2981_v14  ;;  %v2993_v17 = vld [vmem:[#allocation2 + $0x8] sm:$0xff]  ;;  %v2997_v25 = vshrl.u32 %v30_v23, 7  ;;  %v3002_v27 = vld [vmem:[#allocation2] sm:$0xff]  ;;  %s2931_s0 = smov 96   ;;  %vm225_vm2 = vcmask 130048   ;;  %v33_v53 = vand.u32 127, %v30_v23 }
  0x10   :  { %2615 = vmatpush3.msra.mxu1 %v2981_v14  ;;  %2637 = vmatprep.mubr.msk.f32.mxu0 %vm2930_vm1, %v2929_v39  ;;  %v2932_v48 = vmov 1966171168   ;;  %v2473_v52 = vld.sshfl [vmem:[%s3343_s1] sm:$0x11 pattern:$0x75316420] }
  0x11   :  { %2616 = vmatprep.subr.mxu1 %v2983_v15  ;;  %v3000_v26 = vsub.s32 0, %v2997_v25  ;;  %v3005_v28 = vsub.s32 1, %v2997_v25  ;;  %v139_v40 = vsub.s32 7, %v2997_v25  ;;  %v47_v49 = vunpack.c.l.s4 %v2932_v48  ;;  %s2934_s1 = smov 64   ;;  %s2935_s24 = smov 80  }
  0x12   :  { %2617 = vmatpush3.msra.mxu1 %v2983_v15  ;;  %v45_v55 = vcombine.high %v2473_v52, %v2473_v52  ;;  %vm34_vm3 = vcmp.ge.s32.totalorder %v2997_v25, %v33_v53  ;;  %v2933_v58 = vmov -1e+09   ;;  %vm381_vm4 = vcmask 64512   ;;  %s2936_s25 = smov 112   ;;  %s2937_s26 = smov 48  }
  0x13   :  { %102 = vadd.xlane.f32.xlu0 %v101_v3  ;;  %2618 = vmatprep.subr.mxu1 %v2987_v16  ;;  %v128_v29 = vrot.slane %v3002_v27, %v3000_v26  ;;  %v134_v32 = vrot.slane %v3002_v27, %v3005_v28  ;;  %v140_v41 = vrot.slane %v3002_v27, %v139_v40  ;;  %v48_v50 = vunpack.c.0.s8 %v47_v49  ;;  %s2938_s27 = smov 32   ;;  %s2939_s28 = smov 16  }
  0x14   :  { %2619 = vmatpush3.msra.mxu1 %v2987_v16  ;;  %v35_v59 = vsel %vm34_vm3, 0.0, %v2933_v58  ;;  %vm2392_vm5 = vcmask 253952   ;;  %vm2388_vm6 = vcmask 261127  }
  0x15   :  { %2620 = vmatprep.subr.mxu1 %v2993_v17  ;;  %v51_v51 = vsub.s32 %v48_v50, %v2997_v25 }
  0x16   :  { %2621 = vmatpush3.msra.mxu1 %v2993_v17 }
  0x17   :  { %2625 = vmatprep.subr.mxu1 %v2929_v39  ;;  %v52_v54 = vrot.slane %v2473_v52, %v51_v51  ;;  %v59_v57 = vrot.slane %v45_v55, %v51_v51 }
  0x19   :  { %v63_v56 = vrot.slane %v52_v54, %v3000_v26  ;;  %v67_v61 = vrot.slane %v59_v57, %v3000_v26 }
  0x1b   :  { %v3049_v60 = vadd.f32 %v63_v56, %v35_v59 }
  0x98   :  { %v100_v4 = vpop.xlane.xlu0 %99 }
  0x99   :  { %v105_v5 = vmul.f32 0.03125, %v100_v4  ;;  %v3053_v4 = vadd.f32 %v67_v61, %v35_v59 }
  0x9b   :  { %v107_v6 = vsub.f32 %v2966_v0, %v105_v5 }
  0x9c   :  { %v103_v7 = vpop.xlane.xlu0 %102 }
  0x9d   :  { %v106_v8 = vmul.f32 0.03125, %v103_v7  ;;  %v109_v9 = vmul.f32 %v107_v6, %v107_v6 }
  0x9f   :  { %v108_v10 = vsub.f32 %v2971_v1, %v106_v8  ;;  %v111_v11 = vsel %vm97_vm0, %v109_v9, 0.0 }
  0xa0   :  { %112 = vadd.xlane.f32.xlu1 %v111_v11 }
  0xa1   :  { %v110_v12 = vmul.f32 %v108_v10, %v108_v10 }
  0xa3   :  { %v114_v13 = vsel %vm97_vm0, %v110_v12, 0.0 }
  0xa4   :  { %115 = vadd.xlane.f32.xlu1 %v114_v13 }
 0x129   :  { %v113_v18 = vpop.xlane.xlu1 %112 }
 0x12a   :  { %v117_v19 = vmul.f32 0.03125, %v113_v18 }
 0x12c   :  { %v119_v20 = vadd.f32 1e-05, %v117_v19 }
 0x12d   :  { %v116_v21 = vpop.xlane.xlu1 %115 }
 0x12e   :  { %2844 = vrsqrt.f32 %v119_v20  ;;  %v118_v22 = vmul.f32 0.03125, %v116_v21 }
 0x130   :  { %v120_v24 = vadd.f32 1e-05, %v118_v22 }
 0x132   :  { %2846 = vrsqrt.f32 %v120_v24 }
 0x13b   :  { %v2845_v30 = vpop.eup %2844 }
 0x13c   :  { %v123_v31 = vmul.f32 %v2845_v30, %v107_v6 }
 0x13e   :  { %v129_v33 = vmul.f32 %v128_v29, %v123_v31 }
 0x13f   :  { %v2847_v34 = vpop.eup %2846 }
 0x140   :  { %v124_v35 = vmul.f32 %v2847_v34, %v108_v10  ;;  %v135_v36 = vadd.f32 %v134_v32, %v129_v33 }
 0x142   :  { %v130_v37 = vmul.f32 %v128_v29, %v124_v35  ;;  %2622 = vmatprep.mubr.msk.f32.mxu1 %vm97_vm0, %v135_v36 }
 0x144   :  { %v136_v38 = vadd.f32 %v134_v32, %v130_v37 }
 0x146   :  { %2623 = vmatmul.mubr.msk.f32.vlgmr.msra.gmra.mxu1 %vm97_vm0, %v136_v38 }
 0x147   :  { %2627 = vmatprep.mubr.msk.f32.mxu1 %vm2930_vm1, %v2929_v39 }
 0x206   :  { %v2624_v42 = vpop.f32.mrf.mxu1 }
 0x207   :  { %v3023_v43 = vadd.f32 %v2624_v42, %v140_v41 }
 0x208   :  { %v213_v44 = vpop.f32.mrf.mxu1 }
 0x209   :  { %v3025_v45 = vadd.f32 %v213_v44, %v140_v41  ;;  %301 = vrot.lane.b32.xlu1 %v3023_v43, %s2931_s0 }
 0x20b   :  { %223 = vrot.lane.b32.xlu0 %v3025_v45, %s2931_s0 }
 0x27b   :  { %v302_v47 = vpop.permute.xlu1 %301 }
 0x27d   :  { %v224_v46 = vpop.permute.xlu0 %223 }
 0x27e   :  { %2626 = vmatpush3.xpose.msk.msra.mxu1 %vm225_vm2, %v224_v46 }
 0x27f   :  { %2630 = vmatprep.subr.mxu1 %v2929_v39 }
 0x281   :  { %2628 = vmatmul.mubr.msk.f32.vlgmr.msra.gmra.mxu1 %vm225_vm2, %v3025_v45 }
 0x282   :  { %2631 = vmatpush3.xpose.msk.msra.mxu1 %vm225_vm2, %v302_v47  ;;  %2632 = vmatprep.mubr.msk.f32.mxu1 %vm2930_vm1, %v2929_v39 }
 0x283   :  { %2640 = vmatprep.subr.mxu1 %v2929_v39 }
 0x285   :  { %2633 = vmatmul.mubr.msk.f32.vlgmr.msra.gmra.mxu1 %vm225_vm2, %v3023_v43 }
 0x286   :  { %2642 = vmatprep.mubr.msk.f32.mxu1 %vm2930_vm1, %v2929_v39 }
 0x341   :  { %v296_v62 = vpop.f32.mrf.mxu1 }
 0x342   :  { %v377_v63 = vmul.f32 0.25, %v296_v62 }
 0x343   :  { %v2629_v2 = vpop.f32.mrf.mxu1 }
 0x344   :  { %v379_v3 = vadd.f32 %v377_v63, %v3049_v60 }
 0x345   :  { %v373_v5 = vpop.f32.mrf.mxu1 }
 0x346   :  { %v378_v6 = vmul.f32 0.25, %v373_v5  ;;  %v382_v7 = vsel %vm381_vm4, %v379_v3, -inf }
 0x347   :  { %383 = vmax.xlane.f32.xlu1 %v382_v7  ;;  %v2634_v8 = vpop.f32.mrf.mxu1 }
 0x348   :  { %v380_v9 = vadd.f32 %v378_v6, %v3053_v4 }
 0x34a   :  { %v385_v10 = vsel %vm381_vm4, %v380_v9, -inf }
 0x34b   :  { %386 = vmax.xlane.f32.xlu0 %v385_v10 }
 0x358   :  { %480 = vrot.lane.b32.xlu1 %v3023_v43, %s2934_s1 }
 0x35c   :  { %558 = vrot.lane.b32.xlu1 %v3025_v45, %s2935_s24 }
 0x360   :  { %636 = vrot.lane.b32.xlu1 %v3023_v43, %s2935_s24 }
 0x3d0   :  { %v384_v11 = vpop.xlane.xlu1 %383 }
 0x3d1   :  { %v388_v12 = vsub.f32 %v379_v3, %v384_v11 }
 0x3d3   :  { %v390_v13 = vmul.f32 1.442695, %v388_v12 }
 0x3d4   :  { %v481_v18 = vpop.permute.xlu1 %480  ;;  %v387_v19 = vpop.xlane.xlu0 %386 }
 0x3d5   :  { %2848 = vpow2.f32 %v390_v13  ;;  %v389_v20 = vsub.f32 %v380_v9, %v387_v19  ;;  %2641 = vmatpush3.msra.mxu1 %v481_v18 }
 0x3d6   :  { %2650 = vmatprep.subr.mxu1 %v2929_v39 }
 0x3d7   :  { %v392_v21 = vmul.f32 1.442695, %v389_v20 }
 0x3d8   :  { %v559_v30 = vpop.permute.xlu1 %558 }
 0x3d9   :  { %2850 = vpow2.f32 %v392_v21 }
 0x3dc   :  { %v637_v31 = vpop.permute.xlu1 %636 }
 0x3e2   :  { %v2849_v22 = vpop.eup %2848 }
 0x3e3   :  { %v394_v23 = vsel %vm381_vm4, %v2849_v22, 0.0 }
 0x3e4   :  { %395 = vadd.xlane.f32.xlu0 %v394_v23 }
 0x3e6   :  { %v2851_v24 = vpop.eup %2850 }
 0x3e7   :  { %v397_v29 = vsel %vm381_vm4, %v2851_v24, 0.0 }
 0x3e8   :  { %398 = vadd.xlane.f32.xlu1 %v397_v29 }
 0x3f9   :  { %634 = vrot.lane.b32.xlu1 %v3023_v43, %s2936_s25 }
 0x3fa   :  { %404 = vrot.lane.b32.xlu0 %v3025_v45, %s2934_s1 }
 0x3fe   :  { %556 = vrot.lane.b32.xlu0 %v3025_v45, %s2936_s25 }
 0x46d   :  { %v396_v32 = vpop.xlane.xlu0 %395 }
 0x46e   :  { %2852 = vrcp.f32 %v396_v32 }
 0x471   :  { %v399_v33 = vpop.xlane.xlu1 %398  ;;  %v405_v34 = vpop.permute.xlu0 %404 }
 0x472   :  { %2854 = vrcp.f32 %v399_v33  ;;  %2636 = vmatpush3.msra.mxu0 %v405_v34 }
 0x473   :  { %2645 = vmatprep.subr.mxu0 %v2929_v39 }
 0x475   :  { %v557_v41 = vpop.permute.xlu0 %556  ;;  %v635_v42 = vpop.permute.xlu1 %634 }
 0x47b   :  { %v2853_v35 = vpop.eup %2852 }
 0x47c   :  { %v401_v36 = vmul.f32 %v2853_v35, %v2849_v22 }
 0x47e   :  { %2638 = vmatmul.mubr.msk.f32.vlgmr.msra.gmra.mxu0 %vm381_vm4, %v401_v36 }
 0x47f   :  { %v2855_v37 = vpop.eup %2854  ;;  %2646 = vmatpush3.xpose.msk.msra.mxu0 %vm225_vm2, %v559_v30  ;;  %2647 = vmatprep.mubr.msk.f32.mxu0 %vm2930_vm1, %v2929_v39 }
 0x480   :  { %v403_v38 = vmul.f32 %v2855_v37, %v2851_v24  ;;  %2655 = vmatprep.subr.mxu0 %v2929_v39 }
 0x482   :  { %2643 = vmatmul.mubr.msk.f32.vlgmr.msra.gmra.mxu1 %vm381_vm4, %v403_v38  ;;  %2648 = vmatmul.mubr.msk.f32.vlgmr.msra.gmra.mxu0 %vm225_vm2, %v557_v41 }
 0x483   :  { %2651 = vmatpush3.xpose.msk.msra.mxu1 %vm225_vm2, %v637_v31  ;;  %2652 = vmatprep.mubr.msk.f32.mxu1 %vm2930_vm1, %v2929_v39  ;;  %v3123_v31 = vsub.s32 2, %v2997_v25 }
 0x484   :  { %2660 = vmatprep.subr.mxu1 %v2929_v39  ;;  %2657 = vmatprep.mubr.msk.f32.mxu0 %vm2930_vm1, %v2929_v39 }
 0x485   :  { %v1002_v32 = vrot.slane %v3002_v27, %v3123_v31 }
 0x486   :  { %2653 = vmatmul.mubr.msk.f32.vlgmr.msra.gmra.mxu1 %vm225_vm2, %v635_v42 }
 0x487   :  { %2662 = vmatprep.mubr.msk.f32.mxu1 %vm2930_vm1, %v2929_v39 }
 0x53e   :  { %v3090_v44 = vpop.f32.mrf.mxu0 }
 0x540   :  { %v2639_v46 = vpop.f32.mrf.mxu0 }
 0x542   :  { %v3092_v47 = vpop.f32.mrf.mxu1  ;;  %v630_v48 = vpop.f32.mrf.mxu0 }
 0x543   :  { %v712_v49 = vmul.f32 0.25, %v630_v48 }
 0x544   :  { %v2644_v50 = vpop.f32.mrf.mxu1  ;;  %v2649_v51 = vpop.f32.mrf.mxu0 }
 0x545   :  { %v714_v52 = vadd.f32 %v712_v49, %v3049_v60 }
 0x546   :  { %v708_v53 = vpop.f32.mrf.mxu1 }
 0x547   :  { %v713_v54 = vmul.f32 0.25, %v708_v53  ;;  %v716_v55 = vsel %vm381_vm4, %v714_v52, -inf  ;;  %v80_v53 = vld [vmem:[#allocation2 + $0x40] sm:$0xff] }
 0x548   :  { %717 = vmax.xlane.f32.xlu0 %v716_v55  ;;  %v2654_v56 = vpop.f32.mrf.mxu1  ;;  %v78_v55 = vld [vmem:[#allocation2 + $0x30] sm:$0xff] }
 0x549   :  { %v715_v57 = vadd.f32 %v713_v54, %v3053_v4  ;;  %v79_v54 = vld [vmem:[#allocation2 + $0x38] sm:$0xff]  ;;  %v77_v56 = vld [vmem:[#allocation2 + $0x28] sm:$0xff] }
 0x54b   :  { %v719_v58 = vsel %vm381_vm4, %v715_v57, -inf }
 0x54c   :  { %720 = vmax.xlane.f32.xlu1 %v719_v58 }
 0x55d   :  { %814 = vrot.lane.b32.xlu1 %v3023_v43, %s2937_s26 }
 0x561   :  { %910 = vrot.lane.b32.xlu1 %v2981_v14, %s2938_s27 }
 0x565   :  { %908 = vrot.lane.b32.xlu1 %v2983_v15, %s2938_s27 }
 0x5d1   :  { %v718_v59 = vpop.xlane.xlu0 %717 }
 0x5d2   :  { %v722_v61 = vsub.f32 %v714_v52, %v718_v59 }
 0x5d4   :  { %v724_v62 = vmul.f32 1.442695, %v722_v61 }
 0x5d5   :  { %v721_v63 = vpop.xlane.xlu1 %720 }
 0x5d6   :  { %2856 = vpow2.f32 %v724_v62  ;;  %v723_v2 = vsub.f32 %v715_v57, %v721_v63 }
 0x5d8   :  { %v726_v3 = vmul.f32 1.442695, %v723_v2  ;;  %v3142_v2 = vsub.s32 3, %v2997_v25 }
 0x5d9   :  { %v815_v5 = vpop.permute.xlu1 %814 }
 0x5da   :  { %2858 = vpow2.f32 %v726_v3  ;;  %2661 = vmatpush3.msra.mxu1 %v815_v5  ;;  %v1039_v3 = vsub.s32 4, %v2997_v25  ;;  %v1034_v5 = vrot.slane %v3002_v27, %v3142_v2 }
 0x5e3   :  { %v2857_v6 = vpop.eup %2856 }
 0x5e4   :  { %v728_v7 = vsel %vm381_vm4, %v2857_v6, 0.0 }
 0x5e5   :  { %729 = vadd.xlane.f32.xlu0 %v728_v7 }
 0x5e7   :  { %v2859_v8 = vpop.eup %2858 }
 0x5e8   :  { %v731_v9 = vsel %vm381_vm4, %v2859_v8, 0.0 }
 0x5e9   :  { %732 = vadd.xlane.f32.xlu0 %v731_v9 }
 0x5ff   :  { %738 = vrot.lane.b32.xlu0 %v3025_v45, %s2937_s26 }
 0x603   :  { %906 = vrot.lane.b32.xlu0 %v2987_v16, %s2938_s27  ;;  %v911_v16 = vpop.permute.xlu1 %910 }
 0x604   :  { %2665 = vmatprep.subr.mxu1 %v911_v16 }
 0x607   :  { %904 = vrot.lane.b32.xlu0 %v2993_v17, %s2938_s27  ;;  %v909_v15 = vpop.permute.xlu1 %908 }
 0x66e   :  { %v730_v43 = vpop.xlane.xlu0 %729 }
 0x66f   :  { %2860 = vrcp.f32 %v730_v43 }
 0x672   :  { %v733_v10 = vpop.xlane.xlu0 %732 }
 0x673   :  { %2862 = vrcp.f32 %v733_v10 }
 0x676   :  { %v739_v11 = vpop.permute.xlu0 %738 }
 0x677   :  { %2656 = vmatpush3.msra.mxu0 %v739_v11 }
 0x67a   :  { %v907_v18 = vpop.permute.xlu0 %906 }
 0x67c   :  { %v2861_v45 = vpop.eup %2860 }
 0x67d   :  { %v735_v12 = vmul.f32 %v2861_v45, %v2857_v6 }
 0x67e   :  { %v905_v17 = vpop.permute.xlu0 %904 }
 0x67f   :  { %2658 = vmatmul.mubr.msk.f32.vlgmr.msra.gmra.mxu0 %vm381_vm4, %v735_v12 }
 0x680   :  { %v2863_v14 = vpop.eup %2862 }
 0x681   :  { %v737_v13 = vmul.f32 %v2863_v14, %v2859_v8  ;;  %v1040_v8 = vrot.slane %v3002_v27, %v1039_v3  ;;  %v96_v14 = vld [vmem:[#allocation2 + $0xc0] sm:$0xff] }
 0x682   :  { %2687 = vmatprep.subr.mxu0 %v96_v14 }
 0x683   :  { %2663 = vmatmul.mubr.msk.f32.vlgmr.msra.gmra.mxu1 %vm381_vm4, %v737_v13  ;;  %2688 = vmatpush3.msra.mxu0 %v96_v14  ;;  %v95_v13 = vld [vmem:[#allocation2 + $0xb8] sm:$0xff] }
 0x684   :  { %2666 = vmatpush3.msra.mxu1 %v911_v16  ;;  %2689 = vmatprep.subr.mxu0 %v95_v13  ;;  %v94_v16 = vld [vmem:[#allocation2 + $0xb0] sm:$0xff] }
 0x685   :  { %2667 = vmatprep.subr.mxu1 %v909_v15  ;;  %2690 = vmatpush3.msra.mxu0 %v95_v13 }
 0x686   :  { %2668 = vmatpush3.msra.mxu1 %v909_v15  ;;  %2691 = vmatprep.subr.mxu0 %v94_v16  ;;  %v93_v15 = vld [vmem:[#allocation2 + $0xa8] sm:$0xff] }
 0x687   :  { %2669 = vmatprep.subr.mxu1 %v907_v18  ;;  %2692 = vmatpush3.msra.mxu0 %v94_v16 }
 0x688   :  { %2670 = vmatpush3.msra.mxu1 %v907_v18  ;;  %2693 = vmatprep.subr.mxu0 %v93_v15  ;;  %v92_v18 = vld [vmem:[#allocation2 + $0xa0] sm:$0xff] }
 0x689   :  { %2671 = vmatprep.subr.mxu1 %v905_v17  ;;  %2694 = vmatpush3.msra.mxu0 %v93_v15 }
 0x68a   :  { %2672 = vmatpush3.msra.mxu1 %v905_v17  ;;  %v91_v17 = vld [vmem:[#allocation2 + $0x98] sm:$0xff]  ;;  %2695 = vmatprep.subr.mxu0 %v92_v18 }
 0x68b   :  { %2676 = vmatprep.subr.mxu1 %v80_v53  ;;  %2696 = vmatpush3.msra.mxu0 %v92_v18 }
 0x68c   :  { %2697 = vmatprep.subr.mxu0 %v91_v17 }
 0x68d   :  { %2698 = vmatpush3.msra.mxu0 %v91_v17 }
 0x73f   :  { %v810_v19 = vpop.f32.mrf.mxu0 }
 0x740   :  { %892 = vrot.lane.b32.xlu1 %v810_v19, %s2939_s28  ;;  %v90_v19 = vld [vmem:[#allocation2 + $0x90] sm:$0xff] }
 0x741   :  { %v2659_v20 = vpop.f32.mrf.mxu0  ;;  %2699 = vmatprep.subr.mxu0 %v90_v19 }
 0x742   :  { %v89_v20 = vld [vmem:[#allocation2 + $0x88] sm:$0xff]  ;;  %2700 = vmatpush3.msra.mxu0 %v90_v19 }
 0x743   :  { %v886_v21 = vpop.f32.mrf.mxu1  ;;  %2701 = vmatprep.subr.mxu0 %v89_v20  ;;  %v3177_v19 = vld [vmem:[#allocation2 + $0xe8] sm:$0xff] }
 0x744   :  { %894 = vrot.lane.b32.xlu1 %v886_v21, %s2939_s28  ;;  %v88_v21 = vld [vmem:[#allocation2 + $0x80] sm:$0xff]  ;;  %2702 = vmatpush3.msra.mxu0 %v89_v20 }
 0x745   :  { %v2664_v22 = vpop.f32.mrf.mxu1  ;;  %2703 = vmatprep.subr.mxu0 %v88_v21  ;;  %v3179_v20 = vld [vmem:[#allocation2 + $0xe0] sm:$0xff] }
 0x746   :  { %v87_v22 = vld [vmem:[#allocation2 + $0x78] sm:$0xff]  ;;  %2704 = vmatpush3.msra.mxu0 %v88_v21 }
 0x747   :  { %2705 = vmatprep.subr.mxu0 %v87_v22  ;;  %v3183_v21 = vld [vmem:[#allocation2 + $0xd8] sm:$0xff] }
 0x748   :  { %2706 = vmatpush3.msra.mxu0 %v87_v22  ;;  %v3187_v22 = vld [vmem:[#allocation2 + $0xd0] sm:$0xff] }
 0x7b2   :  { %v893_v23 = vpop.permute.xlu1 %892 }
 0x7b3   :  { %v898_v24 = vsel %vm225_vm2, %v3090_v44, %v893_v23  ;;  %v86_v23 = vld [vmem:[#allocation2 + $0x70] sm:$0xff] }
 0x7b4   :  { %2673 = vmatprep.mubr.msk.f32.mxu1 %vm97_vm0, %v898_v24  ;;  %v85_v24 = vld [vmem:[#allocation2 + $0x68] sm:$0xff]  ;;  %2707 = vmatprep.subr.mxu0 %v86_v23 }
 0x7b5   :  { %2708 = vmatpush3.msra.mxu0 %v86_v23 }
 0x7b6   :  { %v895_v29 = vpop.permute.xlu1 %894  ;;  %2709 = vmatprep.subr.mxu0 %v85_v24 }
 0x7b7   :  { %v899_v30 = vsel %vm225_vm2, %v3092_v47, %v895_v29  ;;  %v84_v29 = vld [vmem:[#allocation2 + $0x60] sm:$0xff]  ;;  %2710 = vmatpush3.msra.mxu0 %v85_v24 }
 0x7b8   :  { %2674 = vmatmul.mubr.msk.f32.vlgmr.msra.gmra.mxu1 %vm97_vm0, %v899_v30  ;;  %v83_v30 = vld [vmem:[#allocation2 + $0x58] sm:$0xff]  ;;  %2711 = vmatprep.subr.mxu0 %v84_v29 }
 0x7b9   :  { %2677 = vmatpush3.msra.mxu1 %v80_v53  ;;  %2712 = vmatpush3.msra.mxu0 %v84_v29 }
 0x7ba   :  { %2678 = vmatprep.subr.mxu1 %v79_v54  ;;  %2713 = vmatprep.subr.mxu0 %v83_v30 }
 0x7bb   :  { %2679 = vmatpush3.msra.mxu1 %v79_v54  ;;  %2714 = vmatpush3.msra.mxu0 %v83_v30 }
 0x7bc   :  { %2680 = vmatprep.subr.mxu1 %v78_v55 }
 0x7bd   :  { %2681 = vmatpush3.msra.mxu1 %v78_v55 }
 0x7be   :  { %2682 = vmatprep.subr.mxu1 %v77_v56 }
 0x7bf   :  { %2683 = vmatpush3.msra.mxu1 %v77_v56 }
 0x7c0   :  { %2722 = vmatprep.subr.mxu1 %v3177_v19 }
 0x878   :  { %v2675_v33 = vpop.f32.mrf.mxu1 }
 0x879   :  { %v998_v34 = vadd.f32 %v2675_v33, %v2971_v1  ;;  %v81_v33 = vld [vmem:[#allocation2 + $0x48] sm:$0xff] }
 0x87a   :  { %v988_v35 = vpop.f32.mrf.mxu1 }
 0x87b   :  { %v3128_v36 = vadd.f32 %v1002_v32, %v998_v34  ;;  %v997_v37 = vadd.f32 %v988_v35, %v2966_v0  ;;  %v1045_v34 = vsub.s32 6, %v2997_v25 }
 0x87d   :  { %v3131_v38 = vadd.f32 %v1002_v32, %v997_v37  ;;  %v1008_v41 = vsel %vm97_vm0, %v3128_v36, 0.0  ;;  %v82_v32 = vld [vmem:[#allocation2 + $0x50] sm:$0xff]  ;;  %v1046_v35 = vrot.slane %v3002_v27, %v1045_v34 }
 0x87e   :  { %1009 = vadd.xlane.f32.xlu1 %v1008_v41  ;;  %2715 = vmatprep.subr.mxu0 %v82_v32 }
 0x87f   :  { %v1005_v42 = vsel %vm97_vm0, %v3131_v38, 0.0  ;;  %2716 = vmatpush3.msra.mxu0 %v82_v32 }
 0x880   :  { %1006 = vadd.xlane.f32.xlu0 %v1005_v42  ;;  %2717 = vmatprep.subr.mxu0 %v81_v33 }
 0x881   :  { %2718 = vmatpush3.msra.mxu0 %v81_v33 }
 0x882   :  { %2763 = vmatprep.subr.mxu0 %v2929_v39 }
 0x907   :  { %v1010_v44 = vpop.xlane.xlu1 %1009 }
 0x908   :  { %v1012_v46 = vmul.f32 0.03125, %v1010_v44 }
 0x909   :  { %v1007_v47 = vpop.xlane.xlu0 %1006 }
 0x90a   :  { %v1011_v48 = vmul.f32 0.03125, %v1007_v47  ;;  %v1014_v1 = vsub.f32 %v3128_v36, %v1012_v46 }
 0x90c   :  { %v1013_v49 = vsub.f32 %v3131_v38, %v1011_v48  ;;  %v1016_v51 = vmul.f32 %v1014_v1, %v1014_v1 }
 0x90e   :  { %v1015_v50 = vmul.f32 %v1013_v49, %v1013_v49  ;;  %v1020_v52 = vsel %vm97_vm0, %v1016_v51, 0.0 }
 0x910   :  { %v1017_v0 = vsel %vm97_vm0, %v1015_v50, 0.0 }
 0x911   :  { %1018 = vadd.xlane.f32.xlu0 %v1017_v0 }
 0x915   :  { %1021 = vadd.xlane.f32.xlu0 %v1020_v52 }
 0x99a   :  { %v1019_v57 = vpop.xlane.xlu0 %1018 }
 0x99b   :  { %v1023_v58 = vmul.f32 0.03125, %v1019_v57 }
 0x99d   :  { %v1025_v59 = vadd.f32 1e-05, %v1023_v58 }
 0x99e   :  { %v1022_v61 = vpop.xlane.xlu0 %1021 }
 0x99f   :  { %2864 = vrsqrt.f32 %v1025_v59  ;;  %v1024_v62 = vmul.f32 0.03125, %v1022_v61 }
 0x9a1   :  { %v1026_v63 = vadd.f32 1e-05, %v1024_v62 }
 0x9a3   :  { %2866 = vrsqrt.f32 %v1026_v63  ;;  %v1225_v63 = vsub.s32 5, %v2997_v25 }
 0x9ac   :  { %v2865_v6 = vpop.eup %2864 }
 0x9ad   :  { %v1029_v7 = vmul.f32 %v2865_v6, %v1013_v49 }
 0x9af   :  { %v1035_v9 = vmul.f32 %v1034_v5, %v1029_v7 }
 0x9b0   :  { %v2867_v43 = vpop.eup %2866 }
 0x9b1   :  { %v1030_v10 = vmul.f32 %v2867_v43, %v1014_v1  ;;  %v1041_v11 = vadd.f32 %v1040_v8, %v1035_v9 }
 0x9b3   :  { %v1036_v45 = vmul.f32 %v1034_v5, %v1030_v10  ;;  %2684 = vmatprep.mubr.msk.f32.mxu1 %vm97_vm0, %v1041_v11  ;;  %v1226_v5 = vrot.slane %v3002_v27, %v1225_v63 }
 0x9b5   :  { %v1042_v12 = vadd.f32 %v1040_v8, %v1036_v45 }
 0x9b7   :  { %2685 = vmatmul.mubr.msk.f32.vlgmr.msra.gmra.mxu1 %vm97_vm0, %v1042_v12 }
 0x9b8   :  { %2723 = vmatpush3.msra.mxu1 %v3177_v19 }
 0x9b9   :  { %2724 = vmatprep.subr.mxu1 %v3179_v20 }
 0x9ba   :  { %2725 = vmatpush3.msra.mxu1 %v3179_v20 }
 0x9bb   :  { %2726 = vmatprep.subr.mxu1 %v3183_v21 }
 0x9bc   :  { %2727 = vmatpush3.msra.mxu1 %v3183_v21 }
 0x9bd   :  { %2728 = vmatprep.subr.mxu1 %v3187_v22 }
 0x9be   :  { %2729 = vmatpush3.msra.mxu1 %v3187_v22 }
 0x9bf   :  { %2733 = vmatprep.subr.mxu1 %v2929_v39 }
 0xa77   :  { %v2686_v37 = vpop.f32.mrf.mxu1 }
 0xa78   :  { %v1125_v41 = vadd.f32 %v2686_v37, %v1046_v35 }
 0xa79   :  { %v1119_v42 = vpop.f32.mrf.mxu1 }
 0xa7a   :  { %v1131_v44 = vmul.f32 0.044715, %v1125_v41  ;;  %v1120_v46 = vadd.f32 %v1119_v42, %v1046_v35  ;;  %v1129_v59 = vmul.f32 0.5, %v1125_v41  ;;  %v3194_v35 = vld [vmem:[#allocation2 + $0xc8] sm:$0xff] }
 0xa7c   :  { %v1133_v47 = vmul.f32 %v1131_v44, %v1125_v41  ;;  %v1130_v48 = vmul.f32 0.044715, %v1120_v46  ;;  %v1128_v57 = vmul.f32 0.5, %v1120_v46 }
 0xa7e   :  { %v1135_v1 = vmul.f32 %v1133_v47, %v1125_v41  ;;  %v1132_v49 = vmul.f32 %v1130_v48, %v1120_v46  ;;  %v1289_v48 = vrot.slane %v3194_v35, %v3005_v28 }
 0xa80   :  { %v1137_v50 = vadd.f32 %v1135_v1, %v1125_v41  ;;  %v1134_v0 = vmul.f32 %v1132_v49, %v1120_v46  ;;  %v1283_v41 = vrot.slane %v3194_v35, %v3000_v26 }
 0xa82   :  { %v1136_v51 = vadd.f32 %v1134_v0, %v1120_v46  ;;  %v1139_v52 = vmul.f32 0.7978846, %v1137_v50  ;;  %v1295_v0 = vrot.slane %v3194_v35, %v139_v40 }
 0xa84   :  { %v1138_v53 = vmul.f32 0.7978846, %v1136_v51  ;;  %2868 = vtanh.f32 %v1139_v52 }
 0xa86   :  { %2870 = vtanh.f32 %v1138_v53 }
 0xa91   :  { %v2869_v54 = vpop.eup %2868 }
 0xa92   :  { %v1143_v56 = vadd.f32 1.0, %v2869_v54 }
 0xa93   :  { %v2871_v55 = vpop.eup %2870 }
 0xa94   :  { %v1142_v58 = vadd.f32 1.0, %v2871_v55  ;;  %v1145_v62 = vmul.f32 %v1143_v56, %v1129_v59 }
 0xa96   :  { %v1144_v61 = vmul.f32 %v1142_v58, %v1128_v57 }
 0xa98   :  { %2719 = vmatprep.mubr.f32.mxu0 %v1144_v61 }
 0xa99   :  { %2720 = vmatmul.mubr.f32.vlgmr.msra.gmra.mxu0 %v1145_v62 }
 0xa9a   :  { %2765 = vmatprep.mubr.msk.f32.mxu0 %vm2930_vm1, %v2929_v39 }
 0xb59   :  { %v2721_v6 = vpop.f32.mrf.mxu0 }
 0xb5a   :  { %v1222_v7 = vadd.f32 %v2721_v6, %v3128_v36 }
 0xb5b   :  { %v1212_v8 = vpop.f32.mrf.mxu0 }
 0xb5c   :  { %v3164_v9 = vadd.f32 %v1226_v5, %v1222_v7  ;;  %v1221_v43 = vadd.f32 %v1212_v8, %v3131_v38 }
 0xb5e   :  { %v3167_v10 = vadd.f32 %v1226_v5, %v1221_v43  ;;  %v1257_v11 = vsel %vm97_vm0, %v3164_v9, 0.0 }
 0xb5f   :  { %1258 = vadd.xlane.f32.xlu1 %v1257_v11 }
 0xb60   :  { %v1254_v45 = vsel %vm97_vm0, %v3167_v10, 0.0 }
 0xb61   :  { %1255 = vadd.xlane.f32.xlu0 %v1254_v45 }
 0xbe8   :  { %v1259_v12 = vpop.xlane.xlu1 %1258 }
 0xbe9   :  { %v1261_v27 = vmul.f32 0.03125, %v1259_v12 }
 0xbea   :  { %v1256_v14 = vpop.xlane.xlu0 %1255 }
 0xbeb   :  { %v1263_v36 = vsub.f32 %v3164_v9, %v1261_v27  ;;  %v1260_v13 = vmul.f32 0.03125, %v1256_v14 }
 0xbed   :  { %v1262_v16 = vsub.f32 %v3167_v10, %v1260_v13  ;;  %v1265_v15 = vmul.f32 %v1263_v36, %v1263_v36 }
 0xbef   :  { %v1269_v38 = vsel %vm97_vm0, %v1265_v15, 0.0  ;;  %v1264_v18 = vmul.f32 %v1262_v16, %v1262_v16 }
 0xbf0   :  { %1270 = vadd.xlane.f32.xlu1 %v1269_v38 }
 0xbf1   :  { %v1266_v17 = vsel %vm97_vm0, %v1264_v18, 0.0 }
 0xbf2   :  { %1267 = vadd.xlane.f32.xlu0 %v1266_v17 }
 0xc79   :  { %v1271_v23 = vpop.xlane.xlu1 %1270 }
 0xc7a   :  { %v1273_v24 = vmul.f32 0.03125, %v1271_v23 }
 0xc7b   :  { %v1268_v29 = vpop.xlane.xlu0 %1267 }
 0xc7c   :  { %v1275_v30 = vadd.f32 1e-05, %v1273_v24  ;;  %v1272_v32 = vmul.f32 0.03125, %v1268_v29 }
 0xc7e   :  { %2872 = vrsqrt.f32 %v1275_v30  ;;  %v1274_v33 = vadd.f32 1e-05, %v1272_v32 }
 0xc80   :  { %2874 = vrsqrt.f32 %v1274_v33 }
 0xc8b   :  { %v2873_v37 = vpop.eup %2872 }
 0xc8c   :  { %v1279_v42 = vmul.f32 %v2873_v37, %v1263_v36 }
 0xc8d   :  { %v2875_v44 = vpop.eup %2874 }
 0xc8e   :  { %v1278_v46 = vmul.f32 %v2875_v44, %v1262_v16  ;;  %v1285_v47 = vmul.f32 %v1283_v41, %v1279_v42 }
 0xc90   :  { %v1284_v1 = vmul.f32 %v1283_v41, %v1278_v46  ;;  %v1291_v50 = vadd.f32 %v1289_v48, %v1285_v47 }
 0xc92   :  { %v1290_v49 = vadd.f32 %v1289_v48, %v1284_v1 }
 0xc94   :  { %2730 = vmatprep.mubr.msk.f32.mxu1 %vm97_vm0, %v1290_v49 }
 0xc95   :  { %2731 = vmatmul.mubr.msk.f32.vlgmr.msra.gmra.mxu1 %vm97_vm0, %v1291_v50 }
 0xc96   :  { %2735 = vmatprep.mubr.msk.f32.mxu1 %vm2930_vm1, %v2929_v39 }
 0xd55   :  { %v2732_v51 = vpop.f32.mrf.mxu1 }
 0xd56   :  { %v3207_v52 = vadd.f32 %v2732_v51, %v1295_v0 }
 0xd57   :  { %v1368_v53 = vpop.f32.mrf.mxu1 }
 0xd58   :  { %v3209_v54 = vadd.f32 %v1368_v53, %v1295_v0  ;;  %1455 = vrot.lane.b32.xlu1 %v3207_v52, %s2931_s0 }
 0xd5a   :  { %1378 = vrot.lane.b32.xlu0 %v3209_v54, %s2931_s0 }
 0xdca   :  { %v1456_v56 = vpop.permute.xlu1 %1455 }
 0xdcc   :  { %v1379_v55 = vpop.permute.xlu0 %1378 }
 0xdcd   :  { %2734 = vmatpush3.xpose.msk.msra.mxu1 %vm225_vm2, %v1379_v55 }
 0xdce   :  { %2738 = vmatprep.subr.mxu1 %v2929_v39 }
 0xdd0   :  { %2736 = vmatmul.mubr.msk.f32.vlgmr.msra.gmra.mxu1 %vm225_vm2, %v3209_v54 }
 0xdd1   :  { %2739 = vmatpush3.xpose.msk.msra.mxu1 %vm225_vm2, %v1456_v56  ;;  %2740 = vmatprep.mubr.msk.f32.mxu1 %vm2930_vm1, %v2929_v39 }
 0xdd2   :  { %2743 = vmatprep.subr.mxu1 %v2929_v39 }
 0xdd4   :  { %2741 = vmatmul.mubr.msk.f32.vlgmr.msra.gmra.mxu1 %vm225_vm2, %v3207_v52 }
 0xdd5   :  { %2745 = vmatprep.mubr.msk.f32.mxu1 %vm2930_vm1, %v2929_v39 }
 0xe90   :  { %v1450_v40 = vpop.f32.mrf.mxu1 }
 0xe91   :  { %v1531_v57 = vmul.f32 0.25, %v1450_v40 }
 0xe92   :  { %v2737_v58 = vpop.f32.mrf.mxu1 }
 0xe93   :  { %v1533_v59 = vadd.f32 %v1531_v57, %v3049_v60 }
 0xe94   :  { %v1527_v61 = vpop.f32.mrf.mxu1 }
 0xe95   :  { %v1532_v62 = vmul.f32 0.25, %v1527_v61  ;;  %v1535_v5 = vsel %vm381_vm4, %v1533_v59, -inf }
 0xe96   :  { %1536 = vmax.xlane.f32.xlu1 %v1535_v5  ;;  %v2742_v6 = vpop.f32.mrf.mxu1 }
 0xe97   :  { %v1534_v7 = vadd.f32 %v1532_v62, %v3053_v4 }
 0xe99   :  { %v1538_v8 = vsel %vm381_vm4, %v1534_v7, -inf }
 0xe9a   :  { %1539 = vmax.xlane.f32.xlu0 %v1538_v8 }
 0xea7   :  { %1633 = vrot.lane.b32.xlu1 %v3207_v52, %s2934_s1 }
 0xeab   :  { %1711 = vrot.lane.b32.xlu1 %v3209_v54, %s2935_s24 }
 0xeaf   :  { %1709 = vrot.lane.b32.xlu1 %v3209_v54, %s2936_s25 }
 0xf1f   :  { %v1537_v43 = vpop.xlane.xlu1 %1536 }
 0xf20   :  { %v1541_v11 = vsub.f32 %v1533_v59, %v1537_v43 }
 0xf22   :  { %v1543_v45 = vmul.f32 1.442695, %v1541_v11 }
 0xf23   :  { %v1540_v12 = vpop.xlane.xlu0 %1539  ;;  %v1634_v38 = vpop.permute.xlu1 %1633 }
 0xf24   :  { %2876 = vpow2.f32 %v1543_v45  ;;  %v1542_v27 = vsub.f32 %v1534_v7, %v1540_v12 }
 0xf26   :  { %v1545_v14 = vmul.f32 1.442695, %v1542_v27 }
 0xf27   :  { %v1712_v18 = vpop.permute.xlu1 %1711 }
 0xf28   :  { %2878 = vpow2.f32 %v1545_v14 }
 0xf2b   :  { %v1710_v17 = vpop.permute.xlu1 %1709 }
 0xf31   :  { %v2877_v36 = vpop.eup %2876 }
 0xf32   :  { %v1547_v13 = vsel %vm381_vm4, %v2877_v36, 0.0 }
 0xf33   :  { %1548 = vadd.xlane.f32.xlu0 %v1547_v13 }
 0xf35   :  { %v2879_v16 = vpop.eup %2878 }
 0xf36   :  { %v1550_v15 = vsel %vm381_vm4, %v2879_v16, 0.0 }
 0xf37   :  { %1551 = vadd.xlane.f32.xlu1 %v1550_v15 }
 0xf48   :  { %1787 = vrot.lane.b32.xlu1 %v3207_v52, %s2936_s25 }
 0xf49   :  { %1557 = vrot.lane.b32.xlu0 %v3209_v54, %s2934_s1 }
 0xf4d   :  { %1789 = vrot.lane.b32.xlu0 %v3207_v52, %s2935_s24 }
 0xfbc   :  { %v1549_v23 = vpop.xlane.xlu0 %1548 }
 0xfbd   :  { %2880 = vrcp.f32 %v1549_v23  ;;  %v2155_v23 = vrot.slane %v3194_v35, %v3123_v31 }
 0xfc0   :  { %v1552_v24 = vpop.xlane.xlu1 %1551  ;;  %v1558_v29 = vpop.permute.xlu0 %1557 }
 0xfc1   :  { %2882 = vrcp.f32 %v1552_v24  ;;  %2744 = vmatpush3.msra.mxu1 %v1558_v29 }
 0xfc2   :  { %2748 = vmatprep.subr.mxu1 %v2929_v39 }
 0xfc4   :  { %v1790_v41 = vpop.permute.xlu0 %1789  ;;  %v1788_v42 = vpop.permute.xlu1 %1787 }
 0xfca   :  { %v2881_v30 = vpop.eup %2880 }
 0xfcb   :  { %v1554_v32 = vmul.f32 %v2881_v30, %v2877_v36 }
 0xfcd   :  { %2746 = vmatmul.mubr.msk.f32.vlgmr.msra.gmra.mxu1 %vm381_vm4, %v1554_v32 }
 0xfce   :  { %v2883_v33 = vpop.eup %2882  ;;  %2749 = vmatpush3.msra.mxu1 %v1634_v38  ;;  %2750 = vmatprep.mubr.msk.f32.mxu1 %vm2930_vm1, %v2929_v39 }
 0xfcf   :  { %2753 = vmatprep.subr.mxu1 %v2929_v39  ;;  %v1556_v37 = vmul.f32 %v2883_v33, %v2879_v16 }
 0xfd1   :  { %2751 = vmatmul.mubr.msk.f32.vlgmr.msra.gmra.mxu1 %vm381_vm4, %v1556_v37 }
 0xfd2   :  { %2754 = vmatpush3.xpose.msk.msra.mxu1 %vm225_vm2, %v1712_v18  ;;  %2755 = vmatprep.mubr.msk.f32.mxu1 %vm2930_vm1, %v2929_v39 }
 0xfd3   :  { %2758 = vmatprep.subr.mxu1 %v2929_v39 }
 0xfd5   :  { %2756 = vmatmul.mubr.msk.f32.vlgmr.msra.gmra.mxu1 %vm225_vm2, %v1710_v17 }
 0xfd6   :  { %2759 = vmatpush3.xpose.msk.msra.mxu1 %vm225_vm2, %v1790_v41  ;;  %2760 = vmatprep.mubr.msk.f32.mxu1 %vm2930_vm1, %v2929_v39 }
 0xfd7   :  { %2768 = vmatprep.subr.mxu1 %v2929_v39 }
 0xfd9   :  { %2761 = vmatmul.mubr.msk.f32.vlgmr.msra.gmra.mxu1 %vm225_vm2, %v1788_v42 }
 0xfda   :  { %2770 = vmatprep.mubr.msk.f32.mxu1 %vm2930_vm1, %v2929_v39 }
0x108d   :  { %v3263_v44 = vpop.f32.mrf.mxu1 }
0x108f   :  { %v2747_v46 = vpop.f32.mrf.mxu1 }
0x1091   :  { %v3265_v47 = vpop.f32.mrf.mxu1 }
0x1093   :  { %v2752_v48 = vpop.f32.mrf.mxu1 }
0x1095   :  { %v1783_v1 = vpop.f32.mrf.mxu1 }
0x1096   :  { %v1865_v49 = vmul.f32 0.25, %v1783_v1 }
0x1097   :  { %v2757_v50 = vpop.f32.mrf.mxu1 }
0x1098   :  { %v1867_v0 = vadd.f32 %v1865_v49, %v3049_v60 }
0x1099   :  { %v1861_v51 = vpop.f32.mrf.mxu1 }
0x109a   :  { %v1866_v53 = vmul.f32 0.25, %v1861_v51  ;;  %v1869_v55 = vsel %vm381_vm4, %v1867_v0, -inf  ;;  %v1237_v51 = vld [vmem:[#allocation2 + $0x108] sm:$0xff] }
0x109b   :  { %1870 = vmax.xlane.f32.xlu0 %v1869_v55  ;;  %v2762_v56 = vpop.f32.mrf.mxu1  ;;  %v1235_v55 = vld [vmem:[#allocation2 + $0xf8] sm:$0xff] }
0x109c   :  { %v1868_v40 = vadd.f32 %v1866_v53, %v3053_v4  ;;  %v1236_v53 = vld [vmem:[#allocation2 + $0x100] sm:$0xff]  ;;  %v1234_v56 = vld [vmem:[#allocation2 + $0xf0] sm:$0xff] }
0x109e   :  { %v1872_v39 = vsel %vm381_vm4, %v1868_v40, -inf }
0x109f   :  { %1873 = vmax.xlane.f32.xlu1 %v1872_v39 }
0x10b0   :  { %1967 = vrot.lane.b32.xlu1 %v3207_v52, %s2937_s26 }
0x10b4   :  { %2063 = vrot.lane.b32.xlu1 %v3177_v19, %s2938_s27 }
0x10b8   :  { %2061 = vrot.lane.b32.xlu1 %v3179_v20, %s2938_s27 }
0x1124   :  { %v1871_v60 = vpop.xlane.xlu0 %1870 }
0x1125   :  { %v1875_v57 = vsub.f32 %v1867_v0, %v1871_v60 }
0x1127   :  { %v1877_v58 = vmul.f32 1.442695, %v1875_v57 }
0x1128   :  { %v1874_v59 = vpop.xlane.xlu1 %1873 }
0x1129   :  { %2884 = vpow2.f32 %v1877_v58  ;;  %v1876_v61 = vsub.f32 %v1868_v40, %v1874_v59 }
0x112b   :  { %v1879_v62 = vmul.f32 1.442695, %v1876_v61  ;;  %v2187_v61 = vrot.slane %v3194_v35, %v3142_v2 }
0x112c   :  { %v1968_v4 = vpop.permute.xlu1 %1967 }
0x112d   :  { %2886 = vpow2.f32 %v1879_v62  ;;  %2769 = vmatpush3.msra.mxu1 %v1968_v4 }
0x112e   :  { %2784 = vmatprep.subr.mxu1 %v1237_v51 }
0x1136   :  { %v2885_v5 = vpop.eup %2884 }
0x1137   :  { %v1881_v6 = vsel %vm381_vm4, %v2885_v5, 0.0 }
0x1138   :  { %1882 = vadd.xlane.f32.xlu0 %v1881_v6 }
0x113a   :  { %v2887_v52 = vpop.eup %2886 }
0x113b   :  { %v1884_v19 = vsel %vm381_vm4, %v2887_v52, 0.0 }
0x113c   :  { %1885 = vadd.xlane.f32.xlu0 %v1884_v19 }
0x1152   :  { %1891 = vrot.lane.b32.xlu0 %v3209_v54, %s2937_s26  ;;  %v2064_v54 = vpop.permute.xlu1 %2063 }
0x1156   :  { %2059 = vrot.lane.b32.xlu0 %v3183_v21, %s2938_s27  ;;  %v2062_v21 = vpop.permute.xlu1 %2061 }
0x115a   :  { %2057 = vrot.lane.b32.xlu0 %v3187_v22, %s2938_s27 }
0x11c1   :  { %v1883_v20 = vpop.xlane.xlu0 %1882 }
0x11c2   :  { %2888 = vrcp.f32 %v1883_v20 }
0x11c5   :  { %v1886_v7 = vpop.xlane.xlu0 %1885 }
0x11c6   :  { %2890 = vrcp.f32 %v1886_v7 }
0x11c9   :  { %v1892_v8 = vpop.permute.xlu0 %1891 }
0x11ca   :  { %2764 = vmatpush3.msra.mxu0 %v1892_v8 }
0x11cb   :  { %2773 = vmatprep.subr.mxu0 %v2064_v54 }
0x11cd   :  { %v2060_v27 = vpop.permute.xlu0 %2059 }
0x11cf   :  { %v2889_v43 = vpop.eup %2888 }
0x11d0   :  { %v1888_v11 = vmul.f32 %v2889_v43, %v2885_v5  ;;  %v2193_v5 = vrot.slane %v3194_v35, %v1039_v3  ;;  %v1253_v43 = vld [vmem:[#allocation2 + $0x188] sm:$0xff]  ;;  %v1250_v3 = vld [vmem:[#allocation2 + $0x170] sm:$0xff] }
0x11d1   :  { %v2058_v22 = vpop.permute.xlu0 %2057 }
0x11d2   :  { %2766 = vmatmul.mubr.msk.f32.vlgmr.msra.gmra.mxu0 %vm381_vm4, %v1888_v11  ;;  %v1252_v11 = vld [vmem:[#allocation2 + $0x180] sm:$0xff] }
0x11d3   :  { %v2891_v45 = vpop.eup %2890  ;;  %2774 = vmatpush3.msra.mxu0 %v2064_v54  ;;  %v1248_v54 = vld [vmem:[#allocation2 + $0x160] sm:$0xff] }
0x11d4   :  { %v1890_v12 = vmul.f32 %v2891_v45, %v2887_v52  ;;  %2775 = vmatprep.subr.mxu0 %v2062_v21  ;;  %v1251_v45 = vld [vmem:[#allocation2 + $0x178] sm:$0xff] }
0x11d5   :  { %2776 = vmatpush3.msra.mxu0 %v2062_v21  ;;  %v1247_v21 = vld [vmem:[#allocation2 + $0x158] sm:$0xff] }
0x11d6   :  { %2771 = vmatmul.mubr.msk.f32.vlgmr.msra.gmra.mxu1 %vm381_vm4, %v1890_v12  ;;  %2777 = vmatprep.subr.mxu0 %v2060_v27  ;;  %v1249_v12 = vld [vmem:[#allocation2 + $0x168] sm:$0xff] }
0x11d7   :  { %2778 = vmatpush3.msra.mxu0 %v2060_v27  ;;  %2785 = vmatpush3.msra.mxu1 %v1237_v51  ;;  %v1246_v27 = vld [vmem:[#allocation2 + $0x150] sm:$0xff] }
0x11d8   :  { %2779 = vmatprep.subr.mxu0 %v2058_v22  ;;  %2786 = vmatprep.subr.mxu1 %v1236_v53 }
0x11d9   :  { %2780 = vmatpush3.msra.mxu0 %v2058_v22  ;;  %2787 = vmatpush3.msra.mxu1 %v1236_v53  ;;  %v1245_v22 = vld [vmem:[#allocation2 + $0x148] sm:$0xff] }
0x11da   :  { %2788 = vmatprep.subr.mxu1 %v1235_v55  ;;  %2795 = vmatprep.subr.mxu0 %v1253_v43 }
0x11db   :  { %2789 = vmatpush3.msra.mxu1 %v1235_v55 }
0x11dc   :  { %2790 = vmatprep.subr.mxu1 %v1234_v56 }
0x11dd   :  { %2791 = vmatpush3.msra.mxu1 %v1234_v56 }
0x1292   :  { %v1963_v14 = vpop.f32.mrf.mxu0 }
0x1293   :  { %2045 = vrot.lane.b32.xlu1 %v1963_v14, %s2939_s28  ;;  %v1244_v14 = vld [vmem:[#allocation2 + $0x140] sm:$0xff] }
0x1294   :  { %v2767_v36 = vpop.f32.mrf.mxu0 }
0x1295   :  { %v1243_v36 = vld [vmem:[#allocation2 + $0x138] sm:$0xff] }
0x1296   :  { %v2039_v13 = vpop.f32.mrf.mxu1 }
0x1297   :  { %2047 = vrot.lane.b32.xlu1 %v2039_v13, %s2939_s28  ;;  %v1242_v13 = vld [vmem:[#allocation2 + $0x130] sm:$0xff] }
0x1298   :  { %v2772_v16 = vpop.f32.mrf.mxu1 }
0x1299   :  { %v1241_v16 = vld [vmem:[#allocation2 + $0x128] sm:$0xff] }
0x1305   :  { %v2046_v15 = vpop.permute.xlu1 %2045 }
0x1306   :  { %v2051_v38 = vsel %vm225_vm2, %v3263_v44, %v2046_v15  ;;  %v1240_v15 = vld [vmem:[#allocation2 + $0x120] sm:$0xff] }
0x1307   :  { %2781 = vmatprep.mubr.msk.f32.mxu0 %vm97_vm0, %v2051_v38  ;;  %v1239_v38 = vld [vmem:[#allocation2 + $0x118] sm:$0xff] }
0x1309   :  { %v2048_v18 = vpop.permute.xlu1 %2047 }
0x130a   :  { %v2052_v17 = vsel %vm225_vm2, %v3265_v47, %v2048_v18  ;;  %v1238_v18 = vld [vmem:[#allocation2 + $0x110] sm:$0xff] }
0x130b   :  { %2782 = vmatmul.mubr.msk.f32.vlgmr.msra.gmra.mxu0 %vm97_vm0, %v2052_v17  ;;  %v2199_v17 = vrot.slane %v3194_v35, %v1045_v34 }
0x130c   :  { %2796 = vmatpush3.msra.mxu0 %v1253_v43 }
0x130d   :  { %2797 = vmatprep.subr.mxu0 %v1252_v11 }
0x130e   :  { %2798 = vmatpush3.msra.mxu0 %v1252_v11 }
0x130f   :  { %2799 = vmatprep.subr.mxu0 %v1251_v45 }
0x1310   :  { %2800 = vmatpush3.msra.mxu0 %v1251_v45 }
0x1311   :  { %2801 = vmatprep.subr.mxu0 %v1250_v3 }
0x1312   :  { %2802 = vmatpush3.msra.mxu0 %v1250_v3 }
0x1313   :  { %2803 = vmatprep.subr.mxu0 %v1249_v12 }
0x1314   :  { %2804 = vmatpush3.msra.mxu0 %v1249_v12 }
0x1315   :  { %2805 = vmatprep.subr.mxu0 %v1248_v54 }
0x1316   :  { %2806 = vmatpush3.msra.mxu0 %v1248_v54 }
0x1317   :  { %2807 = vmatprep.subr.mxu0 %v1247_v21 }
0x1318   :  { %2808 = vmatpush3.msra.mxu0 %v1247_v21 }
0x1319   :  { %2809 = vmatprep.subr.mxu0 %v1246_v27 }
0x131a   :  { %2810 = vmatpush3.msra.mxu0 %v1246_v27  ;;  %v2382_v27 = vld [vmem:[#allocation2 + $0x190] sm:$0xff] }
0x131b   :  { %2811 = vmatprep.subr.mxu0 %v1245_v22 }
0x131c   :  { %2812 = vmatpush3.msra.mxu0 %v1245_v22  ;;  %v2434_v22 = vrot.slane %v2382_v27, %v3000_v26 }
0x131d   :  { %2813 = vmatprep.subr.mxu0 %v1244_v14 }
0x131e   :  { %2814 = vmatpush3.msra.mxu0 %v1244_v14 }
0x131f   :  { %2815 = vmatprep.subr.mxu0 %v1243_v36 }
0x1320   :  { %2816 = vmatpush3.msra.mxu0 %v1243_v36 }
0x1321   :  { %2817 = vmatprep.subr.mxu0 %v1242_v13 }
0x1322   :  { %2818 = vmatpush3.msra.mxu0 %v1242_v13  ;;  %v2440_v13 = vrot.slane %v2382_v27, %v3005_v28 }
0x1323   :  { %2819 = vmatprep.subr.mxu0 %v1241_v16 }
0x1324   :  { %2820 = vmatpush3.msra.mxu0 %v1241_v16 }
0x1325   :  { %2821 = vmatprep.subr.mxu0 %v1240_v15 }
0x1326   :  { %2822 = vmatpush3.msra.mxu0 %v1240_v15  ;;  %v2446_v15 = vrot.slane %v2382_v27, %v3123_v31 }
0x1327   :  { %2823 = vmatprep.subr.mxu0 %v1239_v38 }
0x1328   :  { %2824 = vmatpush3.msra.mxu0 %v1239_v38 }
0x1329   :  { %2825 = vmatprep.subr.mxu0 %v1238_v18 }
0x132a   :  { %2826 = vmatpush3.msra.mxu0 %v1238_v18 }
0x13cb   :  { %v2783_v24 = vpop.f32.mrf.mxu0 }
0x13cc   :  { %v2151_v29 = vadd.f32 %v2783_v24, %v3164_v9 }
0x13cd   :  { %v2141_v30 = vpop.f32.mrf.mxu0 }
0x13ce   :  { %v3298_v32 = vadd.f32 %v2155_v23, %v2151_v29  ;;  %v2150_v33 = vadd.f32 %v2141_v30, %v3167_v10 }
0x13d0   :  { %v3301_v37 = vadd.f32 %v2155_v23, %v2150_v33  ;;  %v2161_v41 = vsel %vm97_vm0, %v3298_v32, 0.0 }
0x13d1   :  { %2162 = vadd.xlane.f32.xlu1 %v2161_v41 }
0x13d2   :  { %v2158_v42 = vsel %vm97_vm0, %v3301_v37, 0.0 }
0x13d3   :  { %2159 = vadd.xlane.f32.xlu0 %v2158_v42 }
0x145a   :  { %v2163_v44 = vpop.xlane.xlu1 %2162 }
0x145b   :  { %v2165_v46 = vmul.f32 0.03125, %v2163_v44 }
0x145c   :  { %v2160_v47 = vpop.xlane.xlu0 %2159 }
0x145d   :  { %v2164_v48 = vmul.f32 0.03125, %v2160_v47  ;;  %v2167_v9 = vsub.f32 %v3298_v32, %v2165_v46 }
0x145f   :  { %v2166_v1 = vsub.f32 %v3301_v37, %v2164_v48  ;;  %v2169_v50 = vmul.f32 %v2167_v9, %v2167_v9 }
0x1461   :  { %v2168_v49 = vmul.f32 %v2166_v1, %v2166_v1  ;;  %v2173_v0 = vsel %vm97_vm0, %v2169_v50, 0.0 }
0x1463   :  { %v2170_v10 = vsel %vm97_vm0, %v2168_v49, 0.0 }
0x1464   :  { %2171 = vadd.xlane.f32.xlu0 %v2170_v10 }
0x1468   :  { %2174 = vadd.xlane.f32.xlu0 %v2173_v0 }
0x14ed   :  { %v2172_v40 = vpop.xlane.xlu0 %2171 }
0x14ee   :  { %v2176_v39 = vmul.f32 0.03125, %v2172_v40  ;;  %v2379_v40 = vrot.slane %v3194_v35, %v1225_v63 }
0x14f0   :  { %v2178_v60 = vadd.f32 1e-05, %v2176_v39 }
0x14f1   :  { %v2175_v57 = vpop.xlane.xlu0 %2174 }
0x14f2   :  { %2892 = vrsqrt.f32 %v2178_v60  ;;  %v2177_v58 = vmul.f32 0.03125, %v2175_v57 }
0x14f4   :  { %v2179_v59 = vadd.f32 1e-05, %v2177_v58 }
0x14f6   :  { %2894 = vrsqrt.f32 %v2179_v59 }
0x14ff   :  { %v2893_v62 = vpop.eup %2892 }
0x1500   :  { %v2182_v4 = vmul.f32 %v2893_v62, %v2166_v1 }
0x1502   :  { %v2188_v6 = vmul.f32 %v2187_v61, %v2182_v4 }
0x1503   :  { %v2895_v52 = vpop.eup %2894 }
0x1504   :  { %v2183_v19 = vmul.f32 %v2895_v52, %v2167_v9  ;;  %v2194_v20 = vadd.f32 %v2193_v5, %v2188_v6 }
0x1506   :  { %v2189_v7 = vmul.f32 %v2187_v61, %v2183_v19  ;;  %2792 = vmatprep.mubr.msk.f32.mxu1 %vm97_vm0, %v2194_v20 }
0x1508   :  { %v2195_v8 = vadd.f32 %v2193_v5, %v2189_v7 }
0x150a   :  { %2793 = vmatmul.mubr.msk.f32.vlgmr.msra.gmra.mxu1 %vm97_vm0, %v2195_v8 }
0x15ca   :  { %v2794_v23 = vpop.f32.mrf.mxu1 }
0x15cb   :  { %v2278_v24 = vadd.f32 %v2794_v23, %v2199_v17  ;;  %v2452_v23 = vrot.slane %v2382_v27, %v3142_v2 }
0x15cc   :  { %v2272_v29 = vpop.f32.mrf.mxu1 }
0x15cd   :  { %v2284_v30 = vmul.f32 0.044715, %v2278_v24  ;;  %v2273_v33 = vadd.f32 %v2272_v29, %v2199_v17  ;;  %v2282_v53 = vmul.f32 0.5, %v2278_v24 }
0x15cf   :  { %v2286_v41 = vmul.f32 %v2284_v30, %v2278_v24  ;;  %v2283_v42 = vmul.f32 0.044715, %v2273_v33  ;;  %v2281_v34 = vmul.f32 0.5, %v2273_v33 }
0x15d1   :  { %v2288_v44 = vmul.f32 %v2286_v41, %v2278_v24  ;;  %v2285_v46 = vmul.f32 %v2283_v42, %v2273_v33 }
0x15d3   :  { %v2290_v47 = vadd.f32 %v2288_v44, %v2278_v24  ;;  %v2287_v48 = vmul.f32 %v2285_v46, %v2273_v33 }
0x15d5   :  { %v2289_v9 = vadd.f32 %v2287_v48, %v2273_v33  ;;  %v2292_v1 = vmul.f32 0.7978846, %v2290_v47 }
0x15d7   :  { %v2291_v49 = vmul.f32 0.7978846, %v2289_v9  ;;  %2896 = vtanh.f32 %v2292_v1 }
0x15d9   :  { %2898 = vtanh.f32 %v2291_v49 }
0x15e4   :  { %v2897_v10 = vpop.eup %2896 }
0x15e5   :  { %v2296_v0 = vadd.f32 1.0, %v2897_v10 }
0x15e6   :  { %v2899_v50 = vpop.eup %2898 }
0x15e7   :  { %v2295_v51 = vadd.f32 1.0, %v2899_v50  ;;  %v2298_v56 = vmul.f32 %v2296_v0, %v2282_v53 }
0x15e9   :  { %v2297_v55 = vmul.f32 %v2295_v51, %v2281_v34 }
0x15eb   :  { %2827 = vmatprep.mubr.f32.mxu0 %v2297_v55 }
0x15ec   :  { %2828 = vmatmul.mubr.f32.vlgmr.msra.gmra.mxu0 %v2298_v56 }
0x16ac   :  { %v2829_v39 = vpop.f32.mrf.mxu0 }
0x16ad   :  { %v2375_v60 = vadd.f32 %v2829_v39, %v3298_v32 }
0x16ae   :  { %v2365_v57 = vpop.f32.mrf.mxu0 }
0x16af   :  { %v2381_v58 = vadd.f32 %v2379_v40, %v2375_v60  ;;  %v2374_v59 = vadd.f32 %v2365_v57, %v3301_v37 }
0x16b1   :  { %v2385_v61 = vrot.slane %v2381_v58, 7  ;;  %v2380_v62 = vadd.f32 %v2379_v40, %v2374_v59 }
0x16b3   :  { %v2393_v4 = vsel %vm2392_vm5, %v2385_v61, 0.0  ;;  %v2389_v5 = vsel %vm2388_vm6, %v2380_v62, 0.0 }
0x16b4   :  { %2394 = vadd.xlane.f32.xlu0 %v2393_v4  ;;  %2390 = vadd.xlane.f32.xlu1 %v2389_v5 }
0x173d   :  { %v2395_v25 = vpop.xlane.xlu0 %2394  ;;  %v2391_v6 = vpop.xlane.xlu1 %2390 }
0x173e   :  { %v2397_v63 = vmul.f32 0.03125, %v2395_v25  ;;  %v2396_v35 = vmul.f32 0.03125, %v2391_v6 }
0x1740   :  { %v2400_v52 = vrot.slane %v2397_v63, 1  ;;  %v2403_v32 = vsub.f32 %v2380_v62, %v2396_v35 }
0x1742   :  { %v2404_v19 = vsub.f32 %v2381_v58, %v2400_v52  ;;  %v2405_v20 = vmul.f32 %v2403_v32, %v2403_v32 }
0x1744   :  { %v2412_v37 = vsel %vm2388_vm6, %v2405_v20, 0.0  ;;  %v2406_v7 = vmul.f32 %v2404_v19, %v2404_v19 }
0x1745   :  { %2413 = vadd.xlane.f32.xlu1 %v2412_v37 }
0x1746   :  { %v2409_v8 = vrot.slane %v2406_v7, 7 }
0x1748   :  { %v2415_v43 = vsel %vm2392_vm5, %v2409_v8, 0.0 }
0x1749   :  { %2416 = vadd.xlane.f32.xlu0 %v2415_v43 }
0x17ce   :  { %v2414_v11 = vpop.xlane.xlu1 %2413 }
0x17cf   :  { %v2418_v45 = vmul.f32 0.03125, %v2414_v11 }
0x17d1   :  { %v2420_v3 = vadd.f32 1e-05, %v2418_v45 }
0x17d2   :  { %v2417_v12 = vpop.xlane.xlu0 %2416 }
0x17d3   :  { %2900 = vrsqrt.f32 %v2420_v3  ;;  %v2419_v54 = vmul.f32 0.03125, %v2417_v12 }
0x17d5   :  { %v2421_v21 = vadd.f32 1e-05, %v2419_v54 }
0x17d7   :  { %2902 = vrsqrt.f32 %v2421_v21 }
0x17e0   :  { %v2901_v14 = vpop.eup %2900 }
0x17e1   :  { %v2429_v36 = vmul.f32 %v2901_v14, %v2403_v32 }
0x17e3   :  { %v2435_v16 = vmul.f32 %v2434_v22, %v2429_v36 }
0x17e4   :  { %v2903_v38 = vpop.eup %2902 }
0x17e5   :  { %v2426_v18 = vrot.slane %v2903_v38, 1  ;;  %v2441_v17 = vadd.f32 %v2440_v13, %v2435_v16 }
0x17e7   :  { %v2430_v24 = vmul.f32 %v2426_v18, %v2404_v19  ;;  %v2447_v29 = vmul.f32 %v2446_v15, %v2441_v17 }
0x17e9   :  { %v2453_v30 = vadd.f32 %v2452_v23, %v2447_v29  ;;  %v2436_v33 = vmul.f32 %v2434_v22, %v2430_v24 }
0x17eb   :  { %v2460_v41 = vsel %vm2388_vm6, %v2453_v30, 0.0  ;;  %v2442_v42 = vadd.f32 %v2440_v13, %v2436_v33 }
0x17ec   :  { %2461 = vadd.xlane.f32.xlu0 %v2460_v41 }
0x17ed   :  { %v2448_v26 = vmul.f32 %v2446_v15, %v2442_v42 }
0x17ef   :  { %v2454_v44 = vadd.f32 %v2452_v23, %v2448_v26 }
0x17f1   :  { %v2457_v46 = vrot.slane %v2454_v44, 7 }
0x17f3   :  { %v2463_v28 = vsel %vm2392_vm5, %v2457_v46, 0.0 }
0x17f4   :  { %2464 = vadd.xlane.f32.xlu1 %v2463_v28 }
0x1875   :  { %v2462_v31 = vpop.xlane.xlu0 %2461 }
0x1876   :  { %2466 = vst [vmem:[%s3345_s3 - $0x7] sm:$0x80] %v2462_v31 }
0x187d   :  { %v2465_v2 = vpop.xlane.xlu1 %2464 }
0x187e   :  { %2467 = vst [vmem:[%s3345_s3 + $0x1] sm:$0x1] %v2465_v2 }
0x187f   :  { %2472 = vsyncpa [#allocation3], 1 }

</bundles_post_ra>
